<compile_context>
chip_gen: v6e
topology: v6e:2x2x1
jax: 0.10.0
libtpu: 0.0.40
codegen_flags: <defaults>
</compile_context>

<pallas_src>
import functools
import math

import jax
import jax.numpy as jnp
import numpy as np
from jax.experimental import pallas as pl
from jax.experimental.pallas import tpu as pltpu


def _build_sampling_mats(H, W, max_disp, stride):
    """Host-side separable bilinear sampling matrices (grid_sample,
    align_corners=True, zeros padding), batched over displacements.

    Faithful to the PyTorch reference, including its use of (H-1) in the
    x-offset and (W-1) in the y-offset.
    """
    md = max_disp
    center = (md + 1) / 2.0 - 1.0

    SxTcat = np.zeros((W, md * W), np.float32)   # [src col q, i*W + out col w]
    RepW = np.zeros((W, md * W), np.float32)     # lane-replication of imgA
    for i in range(md):
        dx = (i - center) * stride * (W - 1) / (H - 1)   # ix = w + dx
        for w in range(W):
            ix = w + dx
            x0 = math.floor(ix)
            fx = ix - x0
            if 0 <= x0 <= W - 1:
                SxTcat[x0, i * W + w] += 1.0 - fx
            if 0 <= x0 + 1 <= W - 1:
                SxTcat[x0 + 1, i * W + w] += fx
            RepW[w, i * W + w] = 1.0

    Sycat = np.zeros((md * H, H), np.float32)    # [j*H + out row h, src row p]
    RepH = np.zeros((md * H, H), np.float32)     # sublane-replication of imgA
    for j in range(md):
        dy = (j - center) * stride * (H - 1) / (W - 1)   # iy = h + dy
        for h in range(H):
            iy = h + dy
            y0 = math.floor(iy)
            fy = iy - y0
            if 0 <= y0 <= H - 1:
                Sycat[j * H + h, y0] += 1.0 - fy
            if 0 <= y0 + 1 <= H - 1:
                Sycat[j * H + h, y0 + 1] += fy
            RepH[j * H + h, h] = 1.0

    return SxTcat, Sycat, RepW, RepH


def _corr_kernel(a_ref, b_ref, sxt_ref, sy_ref, repw_ref, reph_ref, o_ref,
                 *, Z, H, W, max_disp):
    # Blocks: a_ref/b_ref = (1, Z*H, W); sxt_ref/repw_ref = (W, md*W);
    #         sy_ref/reph_ref = (md*H, H); o_ref = (1, md*H, md*W).
    f32 = jnp.float32
    md = max_disp

    a_flat = a_ref[0]            # (Z*H, W)
    b_flat = b_ref[0]            # (Z*H, W)
    SxT = sxt_ref[...]           # (W, md*W)
    Sy = sy_ref[...]             # (md*H, H)
    RepW = repw_ref[...]         # (W, md*W)
    RepH = reph_ref[...]         # (md*H, H)

    # Column-sampling stage, batched over channels AND column displacements:
    #   T_all[c*H + p, i*W + w] = sum_q B[c, p, q] * SxT[q, i*W + w]
    T_all = jnp.dot(b_flat, SxT, preferred_element_type=f32)      # (Z*H, md*W)
    # Tile imgA along the column-displacement blocks on the MXU (0/1 weights);
    # this avoids any lane-crossing reshape/tile on the VPU/XLU.
    A_row = jnp.dot(a_flat, RepW, preferred_element_type=f32)     # (Z*H, md*W)

    acc = None
    for c in range(Z):                       # Z is small & static -> unrolled
        Tc = T_all[c * H:(c + 1) * H, :]     # (H, md*W), aligned static slice
        Ac = A_row[c * H:(c + 1) * H, :]     # (H, md*W)
        # Row-sampling stage for all row displacements at once:
        #   Vc[j*H + h, i*W + w] = sampled imgB[c] at displacement (i, j)
        Vc = jnp.dot(Sy, Tc, preferred_element_type=f32)          # (md*H, md*W)
        # Tile imgA over the row-displacement blocks (0/1 matmul, idle MXU).
        Atile = jnp.dot(RepH, Ac, preferred_element_type=f32)     # (md*H, md*W)
        term = Atile * Vc
        acc = term if acc is None else acc + term
    o_ref[0, :, :] = acc                      # lane-dense (144-wide) store


def constraint_correlation(imgA, imgB, *, max_disp=9, stride=1):
    N, Z, H, W = imgA.shape
    md = max_disp

    sxt, sy, repw, reph = _build_sampling_mats(H, W, md, stride)
    sxt = jnp.asarray(sxt)
    sy = jnp.asarray(sy)
    repw = jnp.asarray(repw)
    reph = jnp.asarray(reph)

    a_flat = imgA.reshape(N, Z * H, W).astype(jnp.float32)
    b_flat = imgB.reshape(N, Z * H, W).astype(jnp.float32)

    kernel = functools.partial(_corr_kernel, Z=Z, H=H, W=W, max_disp=md)
    out2d = pl.pallas_call(
        kernel,
        out_shape=jax.ShapeDtypeStruct((N, md * H, md * W), jnp.float32),
        grid=(N,),
        in_specs=[
            pl.BlockSpec((1, Z * H, W), lambda n: (n, 0, 0)),
            pl.BlockSpec((1, Z * H, W), lambda n: (n, 0, 0)),
            pl.BlockSpec((W, md * W), lambda n: (0, 0)),
            pl.BlockSpec((md * H, H), lambda n: (0, 0)),
            pl.BlockSpec((W, md * W), lambda n: (0, 0)),
            pl.BlockSpec((md * H, H), lambda n: (0, 0)),
        ],
        out_specs=pl.BlockSpec((1, md * H, md * W), lambda n: (n, 0, 0)),
        compiler_params=pltpu.CompilerParams(
            dimension_semantics=("parallel",)),
    )(a_flat, b_flat, sxt, sy, repw, reph)

    # out2d[n, j*H + h, i*W + w] == output[n, i*md + j, h, w]
    out = out2d.reshape(N, md, H, md, W).transpose(0, 3, 1, 2, 4)
    return out.reshape(N, md * md, H, W)


def _reference(imgA, imgB, max_disp=9, stride=1):
    """Pure-JAX replica of the PyTorch forward (grid_sample, align_corners=True,
    zeros padding) for correctness checking."""
    N, Z, H, W = imgA.shape
    center = (max_disp + 1) / 2 - 1
    sx = jnp.broadcast_to(jnp.linspace(-1.0, 1.0, W).reshape(1, W), (H, W))
    sy = jnp.broadcast_to(jnp.linspace(-1.0, 1.0, H).reshape(H, 1), (H, W))
    outs = []
    for i in range(max_disp):
        for j in range(max_disp):
            x = sx + 2.0 / (H - 1) * (i - center) * stride
            y = sy + 2.0 / (W - 1) * (j - center) * stride
            ix = (x + 1.0) * 0.5 * (W - 1)
            iy = (y + 1.0) * 0.5 * (H - 1)
            ix0 = jnp.floor(ix)
            iy0 = jnp.floor(iy)
            fx = ix - ix0
            fy = iy - iy0

            def gather(yy, xx):
                valid = (yy >= 0) & (yy <= H - 1) & (xx >= 0) & (xx <= W - 1)
                yc = jnp.clip(yy.astype(jnp.int32), 0, H - 1)
                xc = jnp.clip(xx.astype(jnp.int32), 0, W - 1)
                v = imgB[:, :, yc, xc]  # (N, Z, H, W)
                return jnp.where(valid, v, 0.0)

            samp = (gather(iy0, ix0) * (1 - fy) * (1 - fx) +
                    gather(iy0, ix0 + 1) * (1 - fy) * fx +
                    gather(iy0 + 1, ix0) * fy * (1 - fx) +
                    gather(iy0 + 1, ix0 + 1) * fy * fx)
            outs.append(jnp.sum(imgA * samp, axis=1))
    return jnp.stack(outs, axis=1)


if __name__ == "__main__":
    key = jax.random.PRNGKey(0)
    kA, kB = jax.random.split(key)
    N, Z, H, W = 2, 4, 16, 16
    max_disp, stride = 9, 1

    imgA = jax.random.normal(kA, (N, Z, H, W), dtype=jnp.float32)
    imgB = jax.random.normal(kB, (N, Z, H, W), dtype=jnp.float32)

    out = constraint_correlation(imgA, imgB, max_disp=max_disp, stride=stride)
    out = jax.block_until_ready(out)
    assert out.shape == (N, max_disp * max_disp, H, W)

    ref = jax.block_until_ready(_reference(imgA, imgB, max_disp, stride))
    np.testing.assert_allclose(np.asarray(out), np.asarray(ref),
                               rtol=2e-4, atol=2e-4)
    print("KERNEL_OK")
</pallas_src>

<mosaic_0001>
module attributes {stable_mosaic.version = 11 : i64} {
  func.func @_corr_kernel(%arg0: i32, %arg1: memref<1x64x16xf32, #tpu.memory_space<vmem>>, %arg2: memref<1x64x16xf32, #tpu.memory_space<vmem>>, %arg3: memref<16x144xf32, #tpu.memory_space<vmem>>, %arg4: memref<144x16xf32, #tpu.memory_space<vmem>>, %arg5: memref<16x144xf32, #tpu.memory_space<vmem>>, %arg6: memref<144x16xf32, #tpu.memory_space<vmem>>, %arg7: memref<1x144x144xf32, #tpu.memory_space<vmem>>) attributes {dimension_semantics = [#tpu.dimension_semantics<parallel>], iteration_bounds = array<i64: 2>, scalar_prefetch = 0 : i64, scratch_operands = 0 : i64, tpu.core_type = #tpu.core_type<tc>, window_params = [{transform_indices = @transform_0, window_bounds = array<i64: 1, 64, 16>}, {transform_indices = @transform_1, window_bounds = array<i64: 1, 64, 16>}, {pipeline_mode = #tpu.pipeline_mode<synchronous>, transform_indices = @transform_2, window_bounds = array<i64: 16, 144>}, {pipeline_mode = #tpu.pipeline_mode<synchronous>, transform_indices = @transform_3, window_bounds = array<i64: 144, 16>}, {pipeline_mode = #tpu.pipeline_mode<synchronous>, transform_indices = @transform_4, window_bounds = array<i64: 16, 144>}, {pipeline_mode = #tpu.pipeline_mode<synchronous>, transform_indices = @transform_5, window_bounds = array<i64: 144, 16>}, {transform_indices = @transform_6, window_bounds = array<i64: 1, 144, 144>}]} {
    %c0 = arith.constant 0 : index
    %c0_0 = arith.constant 0 : index
    %c0_1 = arith.constant 0 : index
    %0 = vector.load %arg1[%c0, %c0_0, %c0_1] : memref<1x64x16xf32, #tpu.memory_space<vmem>>, vector<1x64x16xf32>
    %1 = vector.shape_cast %0 : vector<1x64x16xf32> to vector<64x16xf32>
    %c0_2 = arith.constant 0 : index
    %c0_3 = arith.constant 0 : index
    %c0_4 = arith.constant 0 : index
    %2 = vector.load %arg2[%c0_2, %c0_3, %c0_4] : memref<1x64x16xf32, #tpu.memory_space<vmem>>, vector<1x64x16xf32>
    %3 = vector.shape_cast %2 : vector<1x64x16xf32> to vector<64x16xf32>
    %c0_5 = arith.constant 0 : index
    %c0_6 = arith.constant 0 : index
    %4 = vector.load %arg3[%c0_5, %c0_6] : memref<16x144xf32, #tpu.memory_space<vmem>>, vector<16x144xf32>
    %c0_7 = arith.constant 0 : index
    %c0_8 = arith.constant 0 : index
    %5 = vector.load %arg4[%c0_7, %c0_8] : memref<144x16xf32, #tpu.memory_space<vmem>>, vector<144x16xf32>
    %c0_9 = arith.constant 0 : index
    %c0_10 = arith.constant 0 : index
    %6 = vector.load %arg5[%c0_9, %c0_10] : memref<16x144xf32, #tpu.memory_space<vmem>>, vector<16x144xf32>
    %c0_11 = arith.constant 0 : index
    %c0_12 = arith.constant 0 : index
    %7 = vector.load %arg6[%c0_11, %c0_12] : memref<144x16xf32, #tpu.memory_space<vmem>>, vector<144x16xf32>
    %cst = arith.constant dense<0.000000e+00> : vector<64x144xf32>
    %8 = tpu.matmul %3, %4, %cst {dimension_numbers = #tpu.dot_dimension_numbers<[1], [0], [0], [1], [0, 0, 1, 1], [], []>} : vector<64x16xf32>, vector<16x144xf32>, vector<64x144xf32> -> vector<64x144xf32>
    %cst_13 = arith.constant dense<0.000000e+00> : vector<64x144xf32>
    %9 = tpu.matmul %1, %6, %cst_13 {dimension_numbers = #tpu.dot_dimension_numbers<[1], [0], [0], [1], [0, 0, 1, 1], [], []>} : vector<64x16xf32>, vector<16x144xf32>, vector<64x144xf32> -> vector<64x144xf32>
    %10 = vector.extract_strided_slice %8 {offsets = [0, 0], sizes = [16, 144], strides = [1, 1]} : vector<64x144xf32> to vector<16x144xf32>
    %11 = vector.extract_strided_slice %9 {offsets = [0, 0], sizes = [16, 144], strides = [1, 1]} : vector<64x144xf32> to vector<16x144xf32>
    %cst_14 = arith.constant dense<0.000000e+00> : vector<144x144xf32>
    %12 = tpu.matmul %5, %10, %cst_14 {dimension_numbers = #tpu.dot_dimension_numbers<[1], [0], [0], [1], [0, 0, 1, 1], [], []>} : vector<144x16xf32>, vector<16x144xf32>, vector<144x144xf32> -> vector<144x144xf32>
    %cst_15 = arith.constant dense<0.000000e+00> : vector<144x144xf32>
    %13 = tpu.matmul %7, %11, %cst_15 {dimension_numbers = #tpu.dot_dimension_numbers<[1], [0], [0], [1], [0, 0, 1, 1], [], []>} : vector<144x16xf32>, vector<16x144xf32>, vector<144x144xf32> -> vector<144x144xf32>
    %14 = arith.mulf %13, %12 : vector<144x144xf32>
    %15 = vector.extract_strided_slice %8 {offsets = [16, 0], sizes = [16, 144], strides = [1, 1]} : vector<64x144xf32> to vector<16x144xf32>
    %16 = vector.extract_strided_slice %9 {offsets = [16, 0], sizes = [16, 144], strides = [1, 1]} : vector<64x144xf32> to vector<16x144xf32>
    %cst_16 = arith.constant dense<0.000000e+00> : vector<144x144xf32>
    %17 = tpu.matmul %5, %15, %cst_16 {dimension_numbers = #tpu.dot_dimension_numbers<[1], [0], [0], [1], [0, 0, 1, 1], [], []>} : vector<144x16xf32>, vector<16x144xf32>, vector<144x144xf32> -> vector<144x144xf32>
    %cst_17 = arith.constant dense<0.000000e+00> : vector<144x144xf32>
    %18 = tpu.matmul %7, %16, %cst_17 {dimension_numbers = #tpu.dot_dimension_numbers<[1], [0], [0], [1], [0, 0, 1, 1], [], []>} : vector<144x16xf32>, vector<16x144xf32>, vector<144x144xf32> -> vector<144x144xf32>
    %19 = arith.mulf %18, %17 : vector<144x144xf32>
    %20 = arith.addf %14, %19 : vector<144x144xf32>
    %21 = vector.extract_strided_slice %8 {offsets = [32, 0], sizes = [16, 144], strides = [1, 1]} : vector<64x144xf32> to vector<16x144xf32>
    %22 = vector.extract_strided_slice %9 {offsets = [32, 0], sizes = [16, 144], strides = [1, 1]} : vector<64x144xf32> to vector<16x144xf32>
    %cst_18 = arith.constant dense<0.000000e+00> : vector<144x144xf32>
    %23 = tpu.matmul %5, %21, %cst_18 {dimension_numbers = #tpu.dot_dimension_numbers<[1], [0], [0], [1], [0, 0, 1, 1], [], []>} : vector<144x16xf32>, vector<16x144xf32>, vector<144x144xf32> -> vector<144x144xf32>
    %cst_19 = arith.constant dense<0.000000e+00> : vector<144x144xf32>
    %24 = tpu.matmul %7, %22, %cst_19 {dimension_numbers = #tpu.dot_dimension_numbers<[1], [0], [0], [1], [0, 0, 1, 1], [], []>} : vector<144x16xf32>, vector<16x144xf32>, vector<144x144xf32> -> vector<144x144xf32>
    %25 = arith.mulf %24, %23 : vector<144x144xf32>
    %26 = arith.addf %20, %25 : vector<144x144xf32>
    %27 = vector.extract_strided_slice %8 {offsets = [48, 0], sizes = [16, 144], strides = [1, 1]} : vector<64x144xf32> to vector<16x144xf32>
    %28 = vector.extract_strided_slice %9 {offsets = [48, 0], sizes = [16, 144], strides = [1, 1]} : vector<64x144xf32> to vector<16x144xf32>
    %cst_20 = arith.constant dense<0.000000e+00> : vector<144x144xf32>
    %29 = tpu.matmul %5, %27, %cst_20 {dimension_numbers = #tpu.dot_dimension_numbers<[1], [0], [0], [1], [0, 0, 1, 1], [], []>} : vector<144x16xf32>, vector<16x144xf32>, vector<144x144xf32> -> vector<144x144xf32>
    %cst_21 = arith.constant dense<0.000000e+00> : vector<144x144xf32>
    %30 = tpu.matmul %7, %28, %cst_21 {dimension_numbers = #tpu.dot_dimension_numbers<[1], [0], [0], [1], [0, 0, 1, 1], [], []>} : vector<144x16xf32>, vector<16x144xf32>, vector<144x144xf32> -> vector<144x144xf32>
    %31 = arith.mulf %30, %29 : vector<144x144xf32>
    %32 = arith.addf %26, %31 : vector<144x144xf32>
    %c0_22 = arith.constant 0 : index
    %c0_23 = arith.constant 0 : index
    %c0_24 = arith.constant 0 : index
    %33 = vector.load %arg7[%c0_22, %c0_23, %c0_24] : memref<1x144x144xf32, #tpu.memory_space<vmem>>, vector<1x144x144xf32>
    %34 = vector.shape_cast %33 : vector<1x144x144xf32> to vector<144x144xf32>
    %35 = vector.shape_cast %32 : vector<144x144xf32> to vector<1x144x144xf32>
    tpu.vector_store %arg7[%c0_22, %c0_23, %c0_24], %35 {strides = array<i32>} : memref<1x144x144xf32, #tpu.memory_space<vmem>>, vector<1x144x144xf32>,
    return
  }
  func.func @transform_0(%arg0: i32) -> (i32, i32, i32) {
    %c0_i32 = arith.constant 0 : i32
    %c0_i32_0 = arith.constant 0 : i32
    %c0_i32_1 = arith.constant 0 : i32
    return %arg0, %c0_i32, %c0_i32_0 : i32, i32, i32
  }
  func.func @transform_1(%arg0: i32) -> (i32, i32, i32) {
    %c0_i32 = arith.constant 0 : i32
    %c0_i32_0 = arith.constant 0 : i32
    %c0_i32_1 = arith.constant 0 : i32
    return %arg0, %c0_i32, %c0_i32_0 : i32, i32, i32
  }
  func.func @transform_2(%arg0: i32) -> (i32, i32) {
    %c0_i32 = arith.constant 0 : i32
    %c0_i32_0 = arith.constant 0 : i32
    %c0_i32_1 = arith.constant 0 : i32
    return %c0_i32, %c0_i32_0 : i32, i32
  }
  func.func @transform_3(%arg0: i32) -> (i32, i32) {
    %c0_i32 = arith.constant 0 : i32
    %c0_i32_0 = arith.constant 0 : i32
    %c0_i32_1 = arith.constant 0 : i32
    return %c0_i32, %c0_i32_0 : i32, i32
  }
  func.func @transform_4(%arg0: i32) -> (i32, i32) {
    %c0_i32 = arith.constant 0 : i32
    %c0_i32_0 = arith.constant 0 : i32
    %c0_i32_1 = arith.constant 0 : i32
    return %c0_i32, %c0_i32_0 : i32, i32
  }
  func.func @transform_5(%arg0: i32) -> (i32, i32) {
    %c0_i32 = arith.constant 0 : i32
    %c0_i32_0 = arith.constant 0 : i32
    %c0_i32_1 = arith.constant 0 : i32
    return %c0_i32, %c0_i32_0 : i32, i32
  }
  func.func @transform_6(%arg0: i32) -> (i32, i32, i32) {
    %c0_i32 = arith.constant 0 : i32
    %c0_i32_0 = arith.constant 0 : i32
    %c0_i32_1 = arith.constant 0 : i32
    return %arg0, %c0_i32, %c0_i32_0 : i32, i32, i32
  }
}

</mosaic_0001>

<bundles_post_ra>
// kernel: tpu_custom_call.1
= control target key start
LH: loop header
LB: loop body
LE: loop exit
PB: predicated region body
PF: predicated region fallthrough
CT: control target
= control target key end

     0   :  { %11 = vsyncpa [#allocation3], 0  ;;  %s4005_s0 = inlined_call_operand.vmem [shape: f32[2,64,16], index: 0, kind: input, shape index: {}]   ;;  %s4006_s1 = inlined_call_operand.vmem [shape: f32[2,64,16], index: 1, kind: input, shape index: {}]   ;;  %s4007_s2 = inlined_call_operand.vmem [shape: f32[16,144], index: 2, kind: input, shape index: {}]   ;;  %s4008_s3 = inlined_call_operand.vmem [shape: f32[144,16], index: 3, kind: input, shape index: {}]   ;;  %s4009_s4 = inlined_call_operand.vmem [shape: f32[16,144], index: 4, kind: input, shape index: {}]   ;;  %s4010_s5 = inlined_call_operand.vmem [shape: f32[144,16], index: 5, kind: input, shape index: {}]   ;;  %s4011_s6 = inlined_call_operand.hbm [shape: f32[2,144,144], index: 6, kind: output, shape index: {}]  }
   0x1   :  { %13 = vsyncpa [#allocation3 + $0x1], 0  ;;  %s2791_s21 = smov 0   ;;  %s2793_s22 = smov 0  }
   0x2   :  { %s2795_s23 = smov 0   ;;  %s2797_s24 = smov 0  }
   0x3 LB: > { %s2812_s25 = sadd.s32 4294967295, %s2750_s24   ;;  %s2473_s26 = sadd.s32 4294967294, %s2750_s24   ;;  %s2750_s24 = sphi %s2797_s24, %s4017_s24   ;;  %s2746_s23 = sphi %s2795_s23, %s4016_s23   ;;  %s2742_s22 = sphi %s2793_s22, %s4015_s22   ;;  %s2738_s21 = sphi %s2791_s21, %s4014_s21  }
   0x4   : > { %s2816_s27 = sadd.s32 1, %s2750_s24   ;;  %s162_s28 = sadd.s32 1, %s2746_s23 }
   0x5   : > { %s159_s29 = ssub.s32 %s2750_s24, %s2816_s27  ;;  %p172_p0 = scmp.ne.s32.totalorder %s2746_s23, %s2742_s22 }
   0x6   : > { %p160_p1 = scmp.eq.s32.totalorder %s159_s29, 0  ;;  %p173_p2 = scmp.eq.s32.totalorder %s2812_s25, 1 }
   0x7   : > { %p178_p3 = scmp.ne.s32.totalorder %s2742_s22, %s2738_s21  ;;  %p179_p4 = scmp.eq.s32.totalorder %s2473_s26, 1 }
   0x8   : > { %s2827_s30 = scalar_select %p160_p1, %s2746_s23, %s162_s28  }
   0x9   : > { %p2829_p5 = por %p173_p2, %p172_p0  ;;  %p2833_p6 = por %p179_p4, %p178_p3 }
   0xa   : > { %p2476_p7 = scmp.ge.s32.totalorder %s2750_s24, 1  ;;  %p225_p8 = scmp.lt.s32.totalorder %s2750_s24, 3 }
   0xc   : > { %p226_p9 = pnand %p2476_p7, %p225_p8 }
   0xd   : > { %p260_p10 = scmp.lt.s32.totalorder (!%p226_p9), %s2812_s25, 1  ;;  %s257_s15 = sand.u32 (!%p226_p9), 1, %s2742_s22  }
   0xe   : > { %229 = sbr.rel (%p226_p9) target bundleno = 725 (0x2d5), region = 44  ;;  %s2753_s9 = smov (!%p226_p9), [#allocation2]  }
   0xf   : > { %s2646_s16 = smul.u32 (!%p226_p9), 288, %s257_s15 }
  0x10   : > { %s2647_s18 = smul.u32 (!%p226_p9), 4608, %s2812_s25 }
  0x12   : > { %s3955_s28 = scalar_lea.hbm (!%p226_p9), %s4011_s6, %s2647_s18 }
  0x13   : > { %v289_v0 = vld [vmem:[%s4007_s2 + $0x18] sm:$0xff]  ;;  %v288_v2 = vld [vmem:[%s4007_s2 + $0x10] sm:$0xff]  ;;  %v287_v4 = vld [vmem:[%s4007_s2 + $0x8] sm:$0xff]  ;;  %s261_s10 = scalar_select %p260_p10, %s2812_s25, 1  ;;  %v2752_v8 = vmov 0.0   ;;  %vm330_vm0 = vcmask 130048  }
  0x14   : > { %v311_v1 = vld [vmem:[%s4009_s4 + $0x18] sm:$0xff]  ;;  %383 = vmatprep.subr.mxu0 %v289_v0  ;;  %v310_v3 = vld [vmem:[%s4009_s4 + $0x10] sm:$0xff]  ;;  %v309_v5 = vld [vmem:[%s4009_s4 + $0x8] sm:$0xff]  ;;  %419 = vmatprep.mubr.f32.mxu0 %v2752_v8  ;;  %s3965_s25 = scalar_lea.sflag [#allocation3], %s257_s15 }
  0x15   : > { %520 = vmatprep.subr.mxu1 %v311_v1  ;;  %384 = vmatpush1.msra.mxu0 %v288_v2  ;;  %v286_v6 = vld [vmem:[%s4007_s2] sm:$0xff]  ;;  %s2644_s11 = sshll.u32 %s261_s10, 6  ;;  %v2944_v39 = vld [vmem:[%s4008_s3 + $0x8] sm:$0xff]  ;;  %v2960_v45 = vld [vmem:[%s4008_s3 + $0x10] sm:$0xff]  ;;  %s2694_s10 = sshll.u32 %s2753_s9, 4  ;;  %s2695_s10 = int_to_ptr.vmem [resolvable:$false] %s2694_s10 }
  0x16   : > { %521 = vmatpush1.msra.mxu1 %v310_v3  ;;  %v308_v7 = vld [vmem:[%s4009_s4] sm:$0xff]  ;;  %385 = vmatprep.subr.mxu0 %v287_v4  ;;  %s2870_s14 = scalar_lea.vmem %s4006_s1, %s2644_s11  ;;  %s2875_s17 = scalar_lea.vmem %s4005_s0, %s2644_s11  ;;  %v2949_v40 = vld [vmem:[%s4010_s5 + $0x8] sm:$0xff]  ;;  %v2965_v46 = vld [vmem:[%s4010_s5 + $0x10] sm:$0xff] }
  0x17   : > { %522 = vmatprep.subr.mxu1 %v309_v5  ;;  %386 = vmatpush1.msra.mxu0 %v286_v6  ;;  %v278_v9 = vld [vmem:[%s2870_s14] sm:$0xff]  ;;  %v279_v11 = vld [vmem:[%s2870_s14 + $0x8] sm:$0xff]  ;;  %v280_v13 = vld [vmem:[%s2870_s14 + $0x10] sm:$0xff]  ;;  %s2696_s11 = scalar_lea.vmem %s2695_s10, 9216 }
  0x18   : > { %523 = vmatpush1.msra.mxu1 %v308_v7  ;;  %556 = vmatprep.mubr.f32.mxu1 %v2752_v8  ;;  %v270_v10 = vld [vmem:[%s2875_s17] sm:$0xff]  ;;  %v271_v12 = vld [vmem:[%s2875_s17 + $0x8] sm:$0xff]  ;;  %v272_v14 = vld [vmem:[%s2875_s17 + $0x10] sm:$0xff] }
  0x19   : > { %2481 = vmatmul.mubr.msk.f32.vlgmr.msra.gmra.mxu0 %vm330_vm0, %v278_v9  ;;  %2489 = vmatmul.mubr.msk.f32.vlgmr.msra.gmra.mxu1 %vm330_vm0, %v270_v10  ;;  %v281_v15 = vld [vmem:[%s2870_s14 + $0x18] sm:$0xff]  ;;  %v282_v17 = vld [vmem:[%s2870_s14 + $0x20] sm:$0xff]  ;;  %v283_v19 = vld [vmem:[%s2870_s14 + $0x28] sm:$0xff] }
  0x1a   : > { %425 = vmatprep.mubr.f32.mxu0 %v2752_v8  ;;  %562 = vmatprep.mubr.f32.mxu1 %v2752_v8  ;;  %v273_v16 = vld [vmem:[%s2875_s17 + $0x18] sm:$0xff]  ;;  %v274_v18 = vld [vmem:[%s2875_s17 + $0x20] sm:$0xff]  ;;  %v275_v20 = vld [vmem:[%s2875_s17 + $0x28] sm:$0xff] }
  0x1b   : > { %v284_v21 = vld [vmem:[%s2870_s14 + $0x30] sm:$0xff]  ;;  %v285_v23 = vld [vmem:[%s2870_s14 + $0x38] sm:$0xff]  ;;  %v2928_v33 = vld [vmem:[%s4008_s3] sm:$0xff] }
  0x1c   : > { %v276_v22 = vld [vmem:[%s2875_s17 + $0x30] sm:$0xff]  ;;  %v277_v24 = vld [vmem:[%s2875_s17 + $0x38] sm:$0xff]  ;;  %v2933_v34 = vld [vmem:[%s4010_s5] sm:$0xff]  ;;  %s3863_s17 = scalar_lea.vmem [#allocation2], %s2646_s16 }
  0x1d   : > { %2482 = vmatmul.mubr.msk.f32.gmra.mxu0 %vm330_vm0, %v279_v11  ;;  %2490 = vmatmul.mubr.msk.f32.gmra.mxu1 %vm330_vm0, %v271_v12  ;;  %v2984_v51 = vld [vmem:[%s4008_s3 + $0x18] sm:$0xff]  ;;  %v3004_v57 = vld [vmem:[%s4008_s3 + $0x20] sm:$0xff]  ;;  %v3020_v59 = vld [vmem:[%s4008_s3 + $0x28] sm:$0xff]  ;;  %s2399_s19 = sshll.u32 %s3863_s17, 4  ;;  %s3957_s19 = int_to_ptr.vmem [resolvable:$true] %s2399_s19 }
  0x1e   : > { %431 = vmatprep.mubr.f32.mxu0 %v2752_v8  ;;  %568 = vmatprep.mubr.f32.mxu1 %v2752_v8  ;;  %v2989_v52 = vld [vmem:[%s4010_s5 + $0x18] sm:$0xff]  ;;  %v3009_v58 = vld [vmem:[%s4010_s5 + $0x20] sm:$0xff]  ;;  %v3025_v60 = vld [vmem:[%s4010_s5 + $0x28] sm:$0xff]  ;;  %s2690_s29 = scalar_lea.vmem %s3957_s19, 4608  ;;  %p2697_p0 = scmp.lt.s32.totalorder %s3957_s19, %s2695_s10 }
  0x1f   : > { %v3036_v61 = vld [vmem:[%s4008_s3 + $0x30] sm:$0xff]  ;;  %v3052_v63 = vld [vmem:[%s4008_s3 + $0x38] sm:$0xff]  ;;  %v3068_v1 = vld [vmem:[%s4008_s3 + $0x40] sm:$0xff]  ;;  %p2691_p11 = scmp.ne.s32.totalorder %s3957_s19, %s2690_s29  ;;  %p2698_p1 = scmp.lt.s32.totalorder %s2696_s11, %s2690_s29 }
  0x20   : > { %v3041_v62 = vld [vmem:[%s4010_s5 + $0x30] sm:$0xff]  ;;  %v3057_v0 = vld [vmem:[%s4010_s5 + $0x38] sm:$0xff]  ;;  %v3073_v2 = vld [vmem:[%s4010_s5 + $0x40] sm:$0xff] }
  0x21   : > { %2483 = vmatmul.mubr.msk.f32.gmra.mxu0 %vm330_vm0, %v280_v13  ;;  %2491 = vmatmul.mubr.msk.f32.gmra.mxu1 %vm330_vm0, %v272_v14  ;;  %v3084_v3 = vld [vmem:[%s4008_s3 + $0x48] sm:$0xff]  ;;  %v3100_v5 = vld [vmem:[%s4008_s3 + $0x50] sm:$0xff]  ;;  %v3116_v7 = vld [vmem:[%s4008_s3 + $0x58] sm:$0xff]  ;;  %p2692_p12 = pnand %p2691_p11, %p2829_p5  ;;  %p2699_p2 = por %p2698_p1, %p2697_p0 }
  0x22   : > { %437 = vmatprep.mubr.f32.mxu0 %v2752_v8  ;;  %574 = vmatprep.mubr.f32.mxu1 %v2752_v8  ;;  %v3089_v4 = vld [vmem:[%s4010_s5 + $0x48] sm:$0xff]  ;;  %v3105_v6 = vld [vmem:[%s4010_s5 + $0x50] sm:$0xff]  ;;  %v3121_v9 = vld [vmem:[%s4010_s5 + $0x58] sm:$0xff] }
  0x23   : > { %v3132_v10 = vld [vmem:[%s4008_s3 + $0x60] sm:$0xff]  ;;  %v3148_v12 = vld [vmem:[%s4008_s3 + $0x68] sm:$0xff]  ;;  %v3164_v14 = vld [vmem:[%s4008_s3 + $0x70] sm:$0xff]  ;;  %p2693_p13 = pneg %p2692_p12 }
  0x24   : > { %v3137_v11 = vld [vmem:[%s4010_s5 + $0x60] sm:$0xff]  ;;  %v3153_v13 = vld [vmem:[%s4010_s5 + $0x68] sm:$0xff] }
  0x25   : > { %2484 = vmatmul.mubr.msk.f32.gmra.mxu0 %vm330_vm0, %v281_v15  ;;  %2492 = vmatmul.mubr.msk.f32.gmra.mxu1 %vm330_vm0, %v273_v16  ;;  %v3169_v15 = vld [vmem:[%s4010_s5 + $0x70] sm:$0xff]  ;;  %v3180_v16 = vld [vmem:[%s4008_s3 + $0x78] sm:$0xff]  ;;  %p2700_p3 = pnand %p2699_p2, %p2693_p13 }
  0x26   : > { %443 = vmatprep.mubr.f32.mxu0 %v2752_v8  ;;  %580 = vmatprep.mubr.f32.mxu1 %v2752_v8 }
  0x29   : > { %2485 = vmatmul.mubr.msk.f32.gmra.mxu0 %vm330_vm0, %v282_v17  ;;  %2493 = vmatmul.mubr.msk.f32.gmra.mxu1 %vm330_vm0, %v274_v18  ;;  %v3185_v17 = vld [vmem:[%s4010_s5 + $0x78] sm:$0xff]  ;;  %v3196_v18 = vld [vmem:[%s4008_s3 + $0x80] sm:$0xff] }
  0x2a   : > { %449 = vmatprep.mubr.f32.mxu0 %v2752_v8  ;;  %586 = vmatprep.mubr.f32.mxu1 %v2752_v8 }
  0x2d   : > { %2486 = vmatmul.mubr.msk.f32.gmra.mxu0 %vm330_vm0, %v283_v19  ;;  %2494 = vmatmul.mubr.msk.f32.gmra.mxu1 %vm330_vm0, %v275_v20  ;;  %v3201_v19 = vld [vmem:[%s4010_s5 + $0x80] sm:$0xff] }
  0x2e   : > { %455 = vmatprep.mubr.f32.mxu0 %v2752_v8  ;;  %592 = vmatprep.mubr.f32.mxu1 %v2752_v8 }
  0x31   : > { %2487 = vmatmul.mubr.msk.f32.gmra.mxu0 %vm330_vm0, %v284_v21  ;;  %2495 = vmatmul.mubr.msk.f32.gmra.mxu1 %vm330_vm0, %v276_v22  ;;  %v3216_v22 = vld [vmem:[%s4008_s3 + $0x88] sm:$0xff] }
  0x32   : > { %461 = vmatprep.mubr.f32.mxu0 %v2752_v8  ;;  %598 = vmatprep.mubr.f32.mxu1 %v2752_v8 }
  0x35   : > { %2488 = vmatmul.mubr.msk.f32.gmra.mxu0 %vm330_vm0, %v285_v23  ;;  %2496 = vmatmul.mubr.msk.f32.gmra.mxu1 %vm330_vm0, %v277_v24  ;;  %v3221_v23 = vld [vmem:[%s4010_s5 + $0x88] sm:$0xff] }
  0x36   : > { %723 = vmatprep.mubr.f32.mxu0 %v2752_v8  ;;  %950 = vmatprep.mubr.f32.mxu1 %v2752_v8 }
  0xd9   : > { %v421_v25 = vpop.f32.mrf.mxu0  ;;  %v558_v26 = vpop.f32.mrf.mxu1 }
  0xdb   : > { %v423_v27 = vpop.f32.mrf.mxu0  ;;  %v560_v28 = vpop.f32.mrf.mxu1 }
  0xdd   : > { %v427_v29 = vpop.f32.mrf.mxu0  ;;  %v564_v30 = vpop.f32.mrf.mxu1 }
  0xdf   : > { %v429_v31 = vpop.f32.mrf.mxu0  ;;  %v566_v32 = vpop.f32.mrf.mxu1 }
  0xe0   : > { %687 = vmatprep.subr.mxu0 %v429_v31  ;;  %914 = vmatprep.subr.mxu1 %v566_v32 }
  0xe1   : > { %688 = vmatpush1.msra.mxu0 %v427_v29  ;;  %915 = vmatpush1.msra.mxu1 %v564_v30  ;;  %v433_v35 = vpop.f32.mrf.mxu0  ;;  %v570_v36 = vpop.f32.mrf.mxu1 }
  0xe2   : > { %689 = vmatprep.subr.mxu0 %v423_v27  ;;  %916 = vmatprep.subr.mxu1 %v560_v28 }
  0xe3   : > { %690 = vmatpush1.msra.mxu0 %v421_v25  ;;  %917 = vmatpush1.msra.mxu1 %v558_v26  ;;  %v435_v37 = vpop.f32.mrf.mxu0  ;;  %v572_v38 = vpop.f32.mrf.mxu1 }
  0xe4   : > { %2497 = vmatmul.mubr.msk.f32.vlgmr.msra.gmra.mxu0 %vm330_vm0, %v2928_v33  ;;  %2515 = vmatmul.mubr.msk.f32.vlgmr.msra.gmra.mxu1 %vm330_vm0, %v2933_v34 }
  0xe5   : > { %729 = vmatprep.mubr.f32.mxu0 %v2752_v8  ;;  %956 = vmatprep.mubr.f32.mxu1 %v2752_v8  ;;  %v439_v41 = vpop.f32.mrf.mxu0  ;;  %v576_v42 = vpop.f32.mrf.mxu1 }
  0xe7   : > { %v441_v43 = vpop.f32.mrf.mxu0  ;;  %v578_v44 = vpop.f32.mrf.mxu1 }
  0xe8   : > { %2498 = vmatmul.mubr.msk.f32.gmra.mxu0 %vm330_vm0, %v2944_v39  ;;  %2516 = vmatmul.mubr.msk.f32.gmra.mxu1 %vm330_vm0, %v2949_v40 }
  0xe9   : > { %735 = vmatprep.mubr.f32.mxu0 %v2752_v8  ;;  %962 = vmatprep.mubr.f32.mxu1 %v2752_v8  ;;  %v2967_v47 = vpop.f32.mrf.mxu0  ;;  %v2969_v48 = vpop.f32.mrf.mxu1 }
  0xea   : > { %1123 = vmatprep.subr.mxu0 %v441_v43  ;;  %1296 = vmatprep.subr.mxu1 %v578_v44 }
  0xeb   : > { %1124 = vmatpush1.msra.mxu0 %v439_v41  ;;  %1297 = vmatpush1.msra.mxu1 %v576_v42  ;;  %v2971_v49 = vpop.f32.mrf.mxu0  ;;  %v2973_v50 = vpop.f32.mrf.mxu1 }
  0xec   : > { %2499 = vmatmul.mubr.msk.f32.gmra.mxu0 %vm330_vm0, %v2960_v45  ;;  %2517 = vmatmul.mubr.msk.f32.gmra.mxu1 %vm330_vm0, %v2965_v46 }
  0xed   : > { %741 = vmatprep.mubr.f32.mxu0 %v2752_v8  ;;  %968 = vmatprep.mubr.f32.mxu1 %v2752_v8  ;;  %v2991_v53 = vpop.f32.mrf.mxu0  ;;  %v2993_v54 = vpop.f32.mrf.mxu1 }
  0xee   : > { %1125 = vmatprep.subr.mxu0 %v435_v37  ;;  %1298 = vmatprep.subr.mxu1 %v572_v38 }
  0xef   : > { %1126 = vmatpush1.msra.mxu0 %v433_v35  ;;  %1299 = vmatpush1.msra.mxu1 %v570_v36  ;;  %v453_v55 = vpop.f32.mrf.mxu0  ;;  %v590_v56 = vpop.f32.mrf.mxu1 }
  0xf0   : > { %2500 = vmatmul.mubr.msk.f32.gmra.mxu0 %vm330_vm0, %v2984_v51  ;;  %2518 = vmatmul.mubr.msk.f32.gmra.mxu1 %vm330_vm0, %v2989_v52 }
  0xf1   : > { %747 = vmatprep.mubr.f32.mxu0 %v2752_v8  ;;  %974 = vmatprep.mubr.f32.mxu1 %v2752_v8  ;;  %v3207_v20 = vpop.f32.mrf.mxu0  ;;  %v3209_v21 = vpop.f32.mrf.mxu1 }
  0xf2   : > { %1541 = vmatprep.subr.mxu0 %v453_v55  ;;  %1714 = vmatprep.subr.mxu1 %v590_v56 }
  0xf3   : > { %v3227_v24 = vpop.f32.mrf.mxu0  ;;  %v3229_v25 = vpop.f32.mrf.mxu1 }
  0xf4   : > { %2501 = vmatmul.mubr.msk.f32.gmra.mxu0 %vm330_vm0, %v3004_v57  ;;  %2519 = vmatmul.mubr.msk.f32.gmra.mxu1 %vm330_vm0, %v3009_v58 }
  0xf5   : > { %753 = vmatprep.mubr.f32.mxu0 %v2752_v8  ;;  %980 = vmatprep.mubr.f32.mxu1 %v2752_v8  ;;  %v3237_v26 = vpop.f32.mrf.mxu0  ;;  %v3239_v27 = vpop.f32.mrf.mxu1 }
  0xf7   : > { %v465_v28 = vpop.f32.mrf.mxu0  ;;  %v602_v29 = vpop.f32.mrf.mxu1 }
  0xf8   : > { %2502 = vmatmul.mubr.msk.f32.gmra.mxu0 %vm330_vm0, %v3020_v59  ;;  %2520 = vmatmul.mubr.msk.f32.gmra.mxu1 %vm330_vm0, %v3025_v60 }
  0xf9   : > { %759 = vmatprep.mubr.f32.mxu0 %v2752_v8  ;;  %986 = vmatprep.mubr.f32.mxu1 %v2752_v8 }
  0xfc   : > { %2503 = vmatmul.mubr.msk.f32.gmra.mxu0 %vm330_vm0, %v3036_v61  ;;  %2521 = vmatmul.mubr.msk.f32.gmra.mxu1 %vm330_vm0, %v3041_v62 }
  0xfd   : > { %765 = vmatprep.mubr.f32.mxu0 %v2752_v8  ;;  %992 = vmatprep.mubr.f32.mxu1 %v2752_v8 }
 0x100   : > { %2504 = vmatmul.mubr.msk.f32.gmra.mxu0 %vm330_vm0, %v3052_v63  ;;  %2522 = vmatmul.mubr.msk.f32.gmra.mxu1 %vm330_vm0, %v3057_v0 }
 0x101   : > { %771 = vmatprep.mubr.f32.mxu0 %v2752_v8  ;;  %998 = vmatprep.mubr.f32.mxu1 %v2752_v8 }
 0x104   : > { %2505 = vmatmul.mubr.msk.f32.gmra.mxu0 %vm330_vm0, %v3068_v1  ;;  %2523 = vmatmul.mubr.msk.f32.gmra.mxu1 %vm330_vm0, %v3073_v2 }
 0x105   : > { %777 = vmatprep.mubr.f32.mxu0 %v2752_v8  ;;  %1004 = vmatprep.mubr.f32.mxu1 %v2752_v8 }
 0x108   : > { %2506 = vmatmul.mubr.msk.f32.gmra.mxu0 %vm330_vm0, %v3084_v3  ;;  %2524 = vmatmul.mubr.msk.f32.gmra.mxu1 %vm330_vm0, %v3089_v4 }
 0x109   : > { %783 = vmatprep.mubr.f32.mxu0 %v2752_v8  ;;  %1010 = vmatprep.mubr.f32.mxu1 %v2752_v8 }
 0x10c   : > { %2507 = vmatmul.mubr.msk.f32.gmra.mxu0 %vm330_vm0, %v3100_v5  ;;  %2525 = vmatmul.mubr.msk.f32.gmra.mxu1 %vm330_vm0, %v3105_v6 }
 0x10d   : > { %789 = vmatprep.mubr.f32.mxu0 %v2752_v8  ;;  %1016 = vmatprep.mubr.f32.mxu1 %v2752_v8 }
 0x110   : > { %2508 = vmatmul.mubr.msk.f32.gmra.mxu0 %vm330_vm0, %v3116_v7  ;;  %2526 = vmatmul.mubr.msk.f32.gmra.mxu1 %vm330_vm0, %v3121_v9 }
 0x111   : > { %795 = vmatprep.mubr.f32.mxu0 %v2752_v8  ;;  %1022 = vmatprep.mubr.f32.mxu1 %v2752_v8 }
 0x114   : > { %2509 = vmatmul.mubr.msk.f32.gmra.mxu0 %vm330_vm0, %v3132_v10  ;;  %2527 = vmatmul.mubr.msk.f32.gmra.mxu1 %vm330_vm0, %v3137_v11 }
 0x115   : > { %801 = vmatprep.mubr.f32.mxu0 %v2752_v8  ;;  %1028 = vmatprep.mubr.f32.mxu1 %v2752_v8 }
 0x118   : > { %2510 = vmatmul.mubr.msk.f32.gmra.mxu0 %vm330_vm0, %v3148_v12  ;;  %2528 = vmatmul.mubr.msk.f32.gmra.mxu1 %vm330_vm0, %v3153_v13 }
 0x119   : > { %807 = vmatprep.mubr.f32.mxu0 %v2752_v8  ;;  %1034 = vmatprep.mubr.f32.mxu1 %v2752_v8 }
 0x11c   : > { %2511 = vmatmul.mubr.msk.f32.gmra.mxu0 %vm330_vm0, %v3164_v14  ;;  %2529 = vmatmul.mubr.msk.f32.gmra.mxu1 %vm330_vm0, %v3169_v15 }
 0x11d   : > { %813 = vmatprep.mubr.f32.mxu0 %v2752_v8  ;;  %1040 = vmatprep.mubr.f32.mxu1 %v2752_v8 }
 0x120   : > { %2512 = vmatmul.mubr.msk.f32.gmra.mxu0 %vm330_vm0, %v3180_v16  ;;  %2530 = vmatmul.mubr.msk.f32.gmra.mxu1 %vm330_vm0, %v3185_v17 }
 0x121   : > { %819 = vmatprep.mubr.f32.mxu0 %v2752_v8  ;;  %1046 = vmatprep.mubr.f32.mxu1 %v2752_v8 }
 0x124   : > { %2513 = vmatmul.mubr.msk.f32.gmra.mxu0 %vm330_vm0, %v3196_v18  ;;  %2531 = vmatmul.mubr.msk.f32.gmra.mxu1 %vm330_vm0, %v3201_v19 }
 0x125   : > { %825 = vmatprep.mubr.f32.mxu0 %v2752_v8  ;;  %1052 = vmatprep.mubr.f32.mxu1 %v2752_v8 }
 0x128   : > { %2514 = vmatmul.mubr.msk.f32.gmra.mxu0 %vm330_vm0, %v3216_v22  ;;  %2532 = vmatmul.mubr.msk.f32.gmra.mxu1 %vm330_vm0, %v3221_v23 }
 0x129   : > { %1159 = vmatprep.mubr.f32.mxu0 %v2752_v8  ;;  %1332 = vmatprep.mubr.f32.mxu1 %v2752_v8 }
 0x12c   : > { %2533 = vmatmul.mubr.msk.f32.vlgmr.msra.gmra.mxu0 %vm330_vm0, %v2928_v33  ;;  %2551 = vmatmul.mubr.msk.f32.vlgmr.msra.gmra.mxu1 %vm330_vm0, %v2933_v34 }
 0x12d   : > { %1165 = vmatprep.mubr.f32.mxu0 %v2752_v8  ;;  %1338 = vmatprep.mubr.f32.mxu1 %v2752_v8 }
 0x12e   : > { %1542 = vmatpush1.msra.mxu0 %v2991_v53  ;;  %1715 = vmatpush1.msra.mxu1 %v2993_v54 }
 0x12f   : > { %1543 = vmatprep.subr.mxu0 %v2971_v49  ;;  %1716 = vmatprep.subr.mxu1 %v2973_v50 }
 0x130   : > { %2534 = vmatmul.mubr.msk.f32.gmra.mxu0 %vm330_vm0, %v2944_v39  ;;  %2552 = vmatmul.mubr.msk.f32.gmra.mxu1 %vm330_vm0, %v2949_v40 }
 0x131   : > { %1171 = vmatprep.mubr.f32.mxu0 %v2752_v8  ;;  %1344 = vmatprep.mubr.f32.mxu1 %v2752_v8 }
 0x132   : > { %1544 = vmatpush1.msra.mxu0 %v2967_v47  ;;  %1717 = vmatpush1.msra.mxu1 %v2969_v48 }
 0x133   : > { %1959 = vmatprep.subr.mxu0 %v465_v28  ;;  %2132 = vmatprep.subr.mxu1 %v602_v29 }
 0x134   : > { %2535 = vmatmul.mubr.msk.f32.gmra.mxu0 %vm330_vm0, %v2960_v45  ;;  %2553 = vmatmul.mubr.msk.f32.gmra.mxu1 %vm330_vm0, %v2965_v46 }
 0x135   : > { %1177 = vmatprep.mubr.f32.mxu0 %v2752_v8  ;;  %1350 = vmatprep.mubr.f32.mxu1 %v2752_v8 }
 0x138   : > { %2536 = vmatmul.mubr.msk.f32.gmra.mxu0 %vm330_vm0, %v2984_v51  ;;  %2554 = vmatmul.mubr.msk.f32.gmra.mxu1 %vm330_vm0, %v2989_v52 }
 0x139   : > { %1183 = vmatprep.mubr.f32.mxu0 %v2752_v8  ;;  %1356 = vmatprep.mubr.f32.mxu1 %v2752_v8 }
 0x13c   : > { %2537 = vmatmul.mubr.msk.f32.gmra.mxu0 %vm330_vm0, %v3004_v57  ;;  %2555 = vmatmul.mubr.msk.f32.gmra.mxu1 %vm330_vm0, %v3009_v58 }
 0x13d   : > { %1189 = vmatprep.mubr.f32.mxu0 %v2752_v8  ;;  %1362 = vmatprep.mubr.f32.mxu1 %v2752_v8 }
 0x140   : > { %2538 = vmatmul.mubr.msk.f32.gmra.mxu0 %vm330_vm0, %v3020_v59  ;;  %2556 = vmatmul.mubr.msk.f32.gmra.mxu1 %vm330_vm0, %v3025_v60 }
 0x141   : > { %1195 = vmatprep.mubr.f32.mxu0 %v2752_v8  ;;  %1368 = vmatprep.mubr.f32.mxu1 %v2752_v8 }
 0x144   : > { %2539 = vmatmul.mubr.msk.f32.gmra.mxu0 %vm330_vm0, %v3036_v61  ;;  %2557 = vmatmul.mubr.msk.f32.gmra.mxu1 %vm330_vm0, %v3041_v62 }
 0x145   : > { %1201 = vmatprep.mubr.f32.mxu0 %v2752_v8  ;;  %1374 = vmatprep.mubr.f32.mxu1 %v2752_v8 }
 0x148   : > { %2540 = vmatmul.mubr.msk.f32.gmra.mxu0 %vm330_vm0, %v3052_v63  ;;  %2558 = vmatmul.mubr.msk.f32.gmra.mxu1 %vm330_vm0, %v3057_v0 }
 0x149   : > { %1207 = vmatprep.mubr.f32.mxu0 %v2752_v8  ;;  %1380 = vmatprep.mubr.f32.mxu1 %v2752_v8 }
 0x14c   : > { %2541 = vmatmul.mubr.msk.f32.gmra.mxu0 %vm330_vm0, %v3068_v1  ;;  %2559 = vmatmul.mubr.msk.f32.gmra.mxu1 %vm330_vm0, %v3073_v2 }
 0x14d   : > { %1213 = vmatprep.mubr.f32.mxu0 %v2752_v8  ;;  %1386 = vmatprep.mubr.f32.mxu1 %v2752_v8 }
 0x150   : > { %2542 = vmatmul.mubr.msk.f32.gmra.mxu0 %vm330_vm0, %v3084_v3  ;;  %2560 = vmatmul.mubr.msk.f32.gmra.mxu1 %vm330_vm0, %v3089_v4 }
 0x151   : > { %1219 = vmatprep.mubr.f32.mxu0 %v2752_v8  ;;  %1392 = vmatprep.mubr.f32.mxu1 %v2752_v8 }
 0x154   : > { %2543 = vmatmul.mubr.msk.f32.gmra.mxu0 %vm330_vm0, %v3100_v5  ;;  %2561 = vmatmul.mubr.msk.f32.gmra.mxu1 %vm330_vm0, %v3105_v6 }
 0x155   : > { %1225 = vmatprep.mubr.f32.mxu0 %v2752_v8  ;;  %1398 = vmatprep.mubr.f32.mxu1 %v2752_v8 }
 0x158   : > { %2544 = vmatmul.mubr.msk.f32.gmra.mxu0 %vm330_vm0, %v3116_v7  ;;  %2562 = vmatmul.mubr.msk.f32.gmra.mxu1 %vm330_vm0, %v3121_v9 }
 0x159   : > { %1231 = vmatprep.mubr.f32.mxu0 %v2752_v8  ;;  %1404 = vmatprep.mubr.f32.mxu1 %v2752_v8 }
 0x15c   : > { %2545 = vmatmul.mubr.msk.f32.gmra.mxu0 %vm330_vm0, %v3132_v10  ;;  %2563 = vmatmul.mubr.msk.f32.gmra.mxu1 %vm330_vm0, %v3137_v11 }
 0x15d   : > { %1237 = vmatprep.mubr.f32.mxu0 %v2752_v8  ;;  %1410 = vmatprep.mubr.f32.mxu1 %v2752_v8 }
 0x160   : > { %2546 = vmatmul.mubr.msk.f32.gmra.mxu0 %vm330_vm0, %v3148_v12  ;;  %2564 = vmatmul.mubr.msk.f32.gmra.mxu1 %vm330_vm0, %v3153_v13 }
 0x161   : > { %1243 = vmatprep.mubr.f32.mxu0 %v2752_v8  ;;  %1416 = vmatprep.mubr.f32.mxu1 %v2752_v8 }
 0x164   : > { %2547 = vmatmul.mubr.msk.f32.gmra.mxu0 %vm330_vm0, %v3164_v14  ;;  %2565 = vmatmul.mubr.msk.f32.gmra.mxu1 %vm330_vm0, %v3169_v15 }
 0x165   : > { %1249 = vmatprep.mubr.f32.mxu0 %v2752_v8  ;;  %1422 = vmatprep.mubr.f32.mxu1 %v2752_v8 }
 0x168   : > { %2548 = vmatmul.mubr.msk.f32.gmra.mxu0 %vm330_vm0, %v3180_v16  ;;  %2566 = vmatmul.mubr.msk.f32.gmra.mxu1 %vm330_vm0, %v3185_v17 }
 0x169   : > { %1255 = vmatprep.mubr.f32.mxu0 %v2752_v8  ;;  %1428 = vmatprep.mubr.f32.mxu1 %v2752_v8 }
 0x16c   : > { %2549 = vmatmul.mubr.msk.f32.gmra.mxu0 %vm330_vm0, %v3196_v18  ;;  %2567 = vmatmul.mubr.msk.f32.gmra.mxu1 %vm330_vm0, %v3201_v19 }
 0x16d   : > { %1261 = vmatprep.mubr.f32.mxu0 %v2752_v8  ;;  %1434 = vmatprep.mubr.f32.mxu1 %v2752_v8 }
 0x170   : > { %2550 = vmatmul.mubr.msk.f32.gmra.mxu0 %vm330_vm0, %v3216_v22  ;;  %2568 = vmatmul.mubr.msk.f32.gmra.mxu1 %vm330_vm0, %v3221_v23 }
 0x171   : > { %1577 = vmatprep.mubr.f32.mxu0 %v2752_v8  ;;  %1750 = vmatprep.mubr.f32.mxu1 %v2752_v8 }
 0x174   : > { %2569 = vmatmul.mubr.msk.f32.vlgmr.msra.gmra.mxu0 %vm330_vm0, %v2928_v33  ;;  %2587 = vmatmul.mubr.msk.f32.vlgmr.msra.gmra.mxu1 %vm330_vm0, %v2933_v34 }
 0x175   : > { %1583 = vmatprep.mubr.f32.mxu0 %v2752_v8  ;;  %1756 = vmatprep.mubr.f32.mxu1 %v2752_v8 }
 0x176   : > { %1960 = vmatpush1.msra.mxu0 %v3237_v26  ;;  %2133 = vmatpush1.msra.mxu1 %v3239_v27 }
 0x177   : > { %1961 = vmatprep.subr.mxu0 %v3227_v24  ;;  %2134 = vmatprep.subr.mxu1 %v3229_v25 }
 0x178   : > { %2570 = vmatmul.mubr.msk.f32.gmra.mxu0 %vm330_vm0, %v2944_v39  ;;  %2588 = vmatmul.mubr.msk.f32.gmra.mxu1 %vm330_vm0, %v2949_v40 }
 0x179   : > { %1589 = vmatprep.mubr.f32.mxu0 %v2752_v8  ;;  %1762 = vmatprep.mubr.f32.mxu1 %v2752_v8 }
 0x17a   : > { %1962 = vmatpush1.msra.mxu0 %v3207_v20  ;;  %2135 = vmatpush1.msra.mxu1 %v3209_v21 }
 0x17c   : > { %2571 = vmatmul.mubr.msk.f32.gmra.mxu0 %vm330_vm0, %v2960_v45  ;;  %2589 = vmatmul.mubr.msk.f32.gmra.mxu1 %vm330_vm0, %v2965_v46 }
 0x17d   : > { %1595 = vmatprep.mubr.f32.mxu0 %v2752_v8  ;;  %1768 = vmatprep.mubr.f32.mxu1 %v2752_v8 }
 0x180   : > { %2572 = vmatmul.mubr.msk.f32.gmra.mxu0 %vm330_vm0, %v2984_v51  ;;  %2590 = vmatmul.mubr.msk.f32.gmra.mxu1 %vm330_vm0, %v2989_v52 }
 0x181   : > { %1601 = vmatprep.mubr.f32.mxu0 %v2752_v8  ;;  %1774 = vmatprep.mubr.f32.mxu1 %v2752_v8 }
 0x184   : > { %2573 = vmatmul.mubr.msk.f32.gmra.mxu0 %vm330_vm0, %v3004_v57  ;;  %2591 = vmatmul.mubr.msk.f32.gmra.mxu1 %vm330_vm0, %v3009_v58 }
 0x185   : > { %1607 = vmatprep.mubr.f32.mxu0 %v2752_v8  ;;  %1780 = vmatprep.mubr.f32.mxu1 %v2752_v8 }
 0x188   : > { %2574 = vmatmul.mubr.msk.f32.gmra.mxu0 %vm330_vm0, %v3020_v59  ;;  %2592 = vmatmul.mubr.msk.f32.gmra.mxu1 %vm330_vm0, %v3025_v60 }
 0x189   : > { %1613 = vmatprep.mubr.f32.mxu0 %v2752_v8  ;;  %1786 = vmatprep.mubr.f32.mxu1 %v2752_v8 }
 0x18c   : > { %2575 = vmatmul.mubr.msk.f32.gmra.mxu0 %vm330_vm0, %v3036_v61  ;;  %2593 = vmatmul.mubr.msk.f32.gmra.mxu1 %vm330_vm0, %v3041_v62 }
 0x18d   : > { %1619 = vmatprep.mubr.f32.mxu0 %v2752_v8  ;;  %1792 = vmatprep.mubr.f32.mxu1 %v2752_v8 }
 0x190   : > { %2576 = vmatmul.mubr.msk.f32.gmra.mxu0 %vm330_vm0, %v3052_v63  ;;  %2594 = vmatmul.mubr.msk.f32.gmra.mxu1 %vm330_vm0, %v3057_v0 }
 0x191   : > { %1625 = vmatprep.mubr.f32.mxu0 %v2752_v8  ;;  %1798 = vmatprep.mubr.f32.mxu1 %v2752_v8 }
 0x194   : > { %2577 = vmatmul.mubr.msk.f32.gmra.mxu0 %vm330_vm0, %v3068_v1  ;;  %2595 = vmatmul.mubr.msk.f32.gmra.mxu1 %vm330_vm0, %v3073_v2 }
 0x195   : > { %1631 = vmatprep.mubr.f32.mxu0 %v2752_v8  ;;  %1804 = vmatprep.mubr.f32.mxu1 %v2752_v8 }
 0x198   : > { %2578 = vmatmul.mubr.msk.f32.gmra.mxu0 %vm330_vm0, %v3084_v3  ;;  %2596 = vmatmul.mubr.msk.f32.gmra.mxu1 %vm330_vm0, %v3089_v4 }
 0x199   : > { %1637 = vmatprep.mubr.f32.mxu0 %v2752_v8  ;;  %1810 = vmatprep.mubr.f32.mxu1 %v2752_v8 }
 0x19c   : > { %2579 = vmatmul.mubr.msk.f32.gmra.mxu0 %vm330_vm0, %v3100_v5  ;;  %2597 = vmatmul.mubr.msk.f32.gmra.mxu1 %vm330_vm0, %v3105_v6 }
 0x19d   : > { %1643 = vmatprep.mubr.f32.mxu0 %v2752_v8  ;;  %1816 = vmatprep.mubr.f32.mxu1 %v2752_v8 }
 0x1a0   : > { %2580 = vmatmul.mubr.msk.f32.gmra.mxu0 %vm330_vm0, %v3116_v7  ;;  %2598 = vmatmul.mubr.msk.f32.gmra.mxu1 %vm330_vm0, %v3121_v9 }
 0x1a1   : > { %1649 = vmatprep.mubr.f32.mxu0 %v2752_v8  ;;  %1822 = vmatprep.mubr.f32.mxu1 %v2752_v8 }
 0x1a4   : > { %v725_v30 = vpop.f32.mrf.mxu0  ;;  %v952_v31 = vpop.f32.mrf.mxu1  ;;  %2581 = vmatmul.mubr.msk.f32.gmra.mxu0 %vm330_vm0, %v3132_v10  ;;  %2599 = vmatmul.mubr.msk.f32.gmra.mxu1 %vm330_vm0, %v3137_v11 }
 0x1a5   : > { %v3433_v32 = vmul.f32 %v952_v31, %v725_v30  ;;  %1655 = vmatprep.mubr.f32.mxu0 %v2752_v8  ;;  %1828 = vmatprep.mubr.f32.mxu1 %v2752_v8 }
 0x1a6   : > { %v727_v35 = vpop.f32.mrf.mxu0  ;;  %v954_v36 = vpop.f32.mrf.mxu1 }
 0x1a7   : > { %v3437_v37 = vmul.f32 %v954_v36, %v727_v35 }
 0x1a8   : > { %v731_v38 = vpop.f32.mrf.mxu0  ;;  %v958_v41 = vpop.f32.mrf.mxu1  ;;  %2582 = vmatmul.mubr.msk.f32.gmra.mxu0 %vm330_vm0, %v3148_v12  ;;  %2600 = vmatmul.mubr.msk.f32.gmra.mxu1 %vm330_vm0, %v3153_v13 }
 0x1a9   : > { %v3443_v42 = vmul.f32 %v958_v41, %v731_v38  ;;  %1661 = vmatprep.mubr.f32.mxu0 %v2752_v8  ;;  %1834 = vmatprep.mubr.f32.mxu1 %v2752_v8 }
 0x1aa   : > { %v733_v43 = vpop.f32.mrf.mxu0  ;;  %v960_v44 = vpop.f32.mrf.mxu1 }
 0x1ab   : > { %v3447_v47 = vmul.f32 %v960_v44, %v733_v43 }
 0x1ac   : > { %v737_v48 = vpop.f32.mrf.mxu0  ;;  %v964_v49 = vpop.f32.mrf.mxu1  ;;  %2583 = vmatmul.mubr.msk.f32.gmra.mxu0 %vm330_vm0, %v3164_v14  ;;  %2601 = vmatmul.mubr.msk.f32.gmra.mxu1 %vm330_vm0, %v3169_v15 }
 0x1ad   : > { %v3453_v50 = vmul.f32 %v964_v49, %v737_v48  ;;  %1667 = vmatprep.mubr.f32.mxu0 %v2752_v8  ;;  %1840 = vmatprep.mubr.f32.mxu1 %v2752_v8 }
 0x1ae   : > { %v739_v53 = vpop.f32.mrf.mxu0  ;;  %v966_v54 = vpop.f32.mrf.mxu1 }
 0x1af   : > { %v3457_v55 = vmul.f32 %v966_v54, %v739_v53 }
 0x1b0   : > { %v743_v56 = vpop.f32.mrf.mxu0  ;;  %v970_v20 = vpop.f32.mrf.mxu1  ;;  %2584 = vmatmul.mubr.msk.f32.gmra.mxu0 %vm330_vm0, %v3180_v16  ;;  %2602 = vmatmul.mubr.msk.f32.gmra.mxu1 %vm330_vm0, %v3185_v17 }
 0x1b1   : > { %v3463_v21 = vmul.f32 %v970_v20, %v743_v56  ;;  %1673 = vmatprep.mubr.f32.mxu0 %v2752_v8  ;;  %1846 = vmatprep.mubr.f32.mxu1 %v2752_v8 }
 0x1b2   : > { %v745_v24 = vpop.f32.mrf.mxu0  ;;  %v972_v25 = vpop.f32.mrf.mxu1 }
 0x1b3   : > { %v3467_v26 = vmul.f32 %v972_v25, %v745_v24 }
 0x1b4   : > { %v749_v27 = vpop.f32.mrf.mxu0  ;;  %v976_v28 = vpop.f32.mrf.mxu1  ;;  %2585 = vmatmul.mubr.msk.f32.gmra.mxu0 %vm330_vm0, %v3196_v18  ;;  %2603 = vmatmul.mubr.msk.f32.gmra.mxu1 %vm330_vm0, %v3201_v19 }
 0x1b5   : > { %v3473_v29 = vmul.f32 %v976_v28, %v749_v27  ;;  %1679 = vmatprep.mubr.f32.mxu0 %v2752_v8  ;;  %1852 = vmatprep.mubr.f32.mxu1 %v2752_v8 }
 0x1b6   : > { %v751_v30 = vpop.f32.mrf.mxu0  ;;  %v978_v31 = vpop.f32.mrf.mxu1 }
 0x1b7   : > { %v3477_v35 = vmul.f32 %v978_v31, %v751_v30 }
 0x1b8   : > { %v755_v36 = vpop.f32.mrf.mxu0  ;;  %v982_v38 = vpop.f32.mrf.mxu1  ;;  %2586 = vmatmul.mubr.msk.f32.gmra.mxu0 %vm330_vm0, %v3216_v22  ;;  %2604 = vmatmul.mubr.msk.f32.gmra.mxu1 %vm330_vm0, %v3221_v23 }
 0x1b9   : > { %v3483_v41 = vmul.f32 %v982_v38, %v755_v36  ;;  %1995 = vmatprep.mubr.f32.mxu0 %v2752_v8  ;;  %2168 = vmatprep.mubr.f32.mxu1 %v2752_v8 }
 0x1ba   : > { %v757_v43 = vpop.f32.mrf.mxu0  ;;  %v984_v44 = vpop.f32.mrf.mxu1 }
 0x1bb   : > { %v3487_v48 = vmul.f32 %v984_v44, %v757_v43 }
 0x1bc   : > { %v761_v49 = vpop.f32.mrf.mxu0  ;;  %v988_v53 = vpop.f32.mrf.mxu1  ;;  %2605 = vmatmul.mubr.msk.f32.vlgmr.msra.gmra.mxu0 %vm330_vm0, %v2928_v33  ;;  %2623 = vmatmul.mubr.msk.f32.vlgmr.msra.gmra.mxu1 %vm330_vm0, %v2933_v34 }
 0x1bd   : > { %v3493_v54 = vmul.f32 %v988_v53, %v761_v49  ;;  %2001 = vmatprep.mubr.f32.mxu0 %v2752_v8  ;;  %2174 = vmatprep.mubr.f32.mxu1 %v2752_v8 }
 0x1be   : > { %v763_v56 = vpop.f32.mrf.mxu0  ;;  %v990_v20 = vpop.f32.mrf.mxu1 }
 0x1bf   : > { %v3497_v24 = vmul.f32 %v990_v20, %v763_v56 }
 0x1c0   : > { %v767_v25 = vpop.f32.mrf.mxu0  ;;  %v994_v27 = vpop.f32.mrf.mxu1  ;;  %2606 = vmatmul.mubr.msk.f32.gmra.mxu0 %vm330_vm0, %v2944_v39  ;;  %2624 = vmatmul.mubr.msk.f32.gmra.mxu1 %vm330_vm0, %v2949_v40 }
 0x1c1   : > { %v3503_v33 = vmul.f32 %v994_v27, %v767_v25  ;;  %2007 = vmatprep.mubr.f32.mxu0 %v2752_v8  ;;  %2180 = vmatprep.mubr.f32.mxu1 %v2752_v8 }
 0x1c2   : > { %v769_v34 = vpop.f32.mrf.mxu0  ;;  %v996_v28 = vpop.f32.mrf.mxu1 }
 0x1c3   : > { %v3507_v30 = vmul.f32 %v996_v28, %v769_v34 }
 0x1c4   : > { %v773_v31 = vpop.f32.mrf.mxu0  ;;  %v1000_v36 = vpop.f32.mrf.mxu1  ;;  %2607 = vmatmul.mubr.msk.f32.gmra.mxu0 %vm330_vm0, %v2960_v45  ;;  %2625 = vmatmul.mubr.msk.f32.gmra.mxu1 %vm330_vm0, %v2965_v46 }
 0x1c5   : > { %v3513_v39 = vmul.f32 %v1000_v36, %v773_v31  ;;  %2013 = vmatprep.mubr.f32.mxu0 %v2752_v8  ;;  %2186 = vmatprep.mubr.f32.mxu1 %v2752_v8 }
 0x1c6   : > { %v775_v40 = vpop.f32.mrf.mxu0  ;;  %v1002_v38 = vpop.f32.mrf.mxu1 }
 0x1c7   : > { %v3517_v43 = vmul.f32 %v1002_v38, %v775_v40 }
 0x1c8   : > { %v779_v44 = vpop.f32.mrf.mxu0  ;;  %v1006_v49 = vpop.f32.mrf.mxu1  ;;  %2608 = vmatmul.mubr.msk.f32.gmra.mxu0 %vm330_vm0, %v2984_v51  ;;  %2626 = vmatmul.mubr.msk.f32.gmra.mxu1 %vm330_vm0, %v2989_v52 }
 0x1c9   : > { %v3523_v45 = vmul.f32 %v1006_v49, %v779_v44  ;;  %2019 = vmatprep.mubr.f32.mxu0 %v2752_v8  ;;  %2192 = vmatprep.mubr.f32.mxu1 %v2752_v8 }
 0x1ca   : > { %v781_v46 = vpop.f32.mrf.mxu0  ;;  %v1008_v53 = vpop.f32.mrf.mxu1 }
 0x1cb   : > { %v3527_v56 = vmul.f32 %v1008_v53, %v781_v46 }
 0x1cc   : > { %v785_v20 = vpop.f32.mrf.mxu0  ;;  %v1012_v25 = vpop.f32.mrf.mxu1  ;;  %2609 = vmatmul.mubr.msk.f32.gmra.mxu0 %vm330_vm0, %v3004_v57  ;;  %2627 = vmatmul.mubr.msk.f32.gmra.mxu1 %vm330_vm0, %v3009_v58 }
 0x1cd   : > { %v3533_v51 = vmul.f32 %v1012_v25, %v785_v20  ;;  %2025 = vmatprep.mubr.f32.mxu0 %v2752_v8  ;;  %2198 = vmatprep.mubr.f32.mxu1 %v2752_v8 }
 0x1ce   : > { %v787_v52 = vpop.f32.mrf.mxu0  ;;  %v1014_v27 = vpop.f32.mrf.mxu1 }
 0x1cf   : > { %v3537_v34 = vmul.f32 %v1014_v27, %v787_v52 }
 0x1d0   : > { %v791_v28 = vpop.f32.mrf.mxu0  ;;  %v1018_v31 = vpop.f32.mrf.mxu1  ;;  %2610 = vmatmul.mubr.msk.f32.gmra.mxu0 %vm330_vm0, %v3020_v59  ;;  %2628 = vmatmul.mubr.msk.f32.gmra.mxu1 %vm330_vm0, %v3025_v60 }
 0x1d1   : > { %v3543_v57 = vmul.f32 %v1018_v31, %v791_v28  ;;  %2031 = vmatprep.mubr.f32.mxu0 %v2752_v8  ;;  %2204 = vmatprep.mubr.f32.mxu1 %v2752_v8 }
 0x1d2   : > { %v793_v58 = vpop.f32.mrf.mxu0  ;;  %v1020_v36 = vpop.f32.mrf.mxu1 }
 0x1d3   : > { %v3547_v40 = vmul.f32 %v1020_v36, %v793_v58 }
 0x1d4   : > { %v797_v38 = vpop.f32.mrf.mxu0  ;;  %v1024_v44 = vpop.f32.mrf.mxu1  ;;  %2611 = vmatmul.mubr.msk.f32.gmra.mxu0 %vm330_vm0, %v3036_v61  ;;  %2629 = vmatmul.mubr.msk.f32.gmra.mxu1 %vm330_vm0, %v3041_v62 }
 0x1d5   : > { %v3553_v59 = vmul.f32 %v1024_v44, %v797_v38  ;;  %2037 = vmatprep.mubr.f32.mxu0 %v2752_v8  ;;  %2210 = vmatprep.mubr.f32.mxu1 %v2752_v8 }
 0x1d6   : > { %v799_v60 = vpop.f32.mrf.mxu0  ;;  %v1026_v49 = vpop.f32.mrf.mxu1 }
 0x1d7   : > { %v3557_v46 = vmul.f32 %v1026_v49, %v799_v60 }
 0x1d8   : > { %v803_v53 = vpop.f32.mrf.mxu0  ;;  %v1030_v20 = vpop.f32.mrf.mxu1  ;;  %2612 = vmatmul.mubr.msk.f32.gmra.mxu0 %vm330_vm0, %v3052_v63  ;;  %2630 = vmatmul.mubr.msk.f32.gmra.mxu1 %vm330_vm0, %v3057_v0 }
 0x1d9   : > { %v3563_v61 = vmul.f32 %v1030_v20, %v803_v53  ;;  %2043 = vmatprep.mubr.f32.mxu0 %v2752_v8  ;;  %2216 = vmatprep.mubr.f32.mxu1 %v2752_v8 }
 0x1da   : > { %v805_v62 = vpop.f32.mrf.mxu0  ;;  %v1032_v25 = vpop.f32.mrf.mxu1 }
 0x1db   : > { %v3567_v52 = vmul.f32 %v1032_v25, %v805_v62 }
 0x1dc   : > { %v809_v27 = vpop.f32.mrf.mxu0  ;;  %v1036_v28 = vpop.f32.mrf.mxu1  ;;  %2613 = vmatmul.mubr.msk.f32.gmra.mxu0 %vm330_vm0, %v3068_v1  ;;  %2631 = vmatmul.mubr.msk.f32.gmra.mxu1 %vm330_vm0, %v3073_v2 }
 0x1dd   : > { %v3573_v63 = vmul.f32 %v1036_v28, %v809_v27  ;;  %2049 = vmatprep.mubr.f32.mxu0 %v2752_v8  ;;  %2222 = vmatprep.mubr.f32.mxu1 %v2752_v8 }
 0x1de   : > { %v811_v0 = vpop.f32.mrf.mxu0  ;;  %v1038_v31 = vpop.f32.mrf.mxu1 }
 0x1df   : > { %v3577_v58 = vmul.f32 %v1038_v31, %v811_v0 }
 0x1e0   : > { %v815_v36 = vpop.f32.mrf.mxu0  ;;  %v1042_v38 = vpop.f32.mrf.mxu1  ;;  %2614 = vmatmul.mubr.msk.f32.gmra.mxu0 %vm330_vm0, %v3084_v3  ;;  %2632 = vmatmul.mubr.msk.f32.gmra.mxu1 %vm330_vm0, %v3089_v4 }
 0x1e1   : > { %v3583_v1 = vmul.f32 %v1042_v38, %v815_v36  ;;  %2055 = vmatprep.mubr.f32.mxu0 %v2752_v8  ;;  %2228 = vmatprep.mubr.f32.mxu1 %v2752_v8 }
 0x1e2   : > { %v817_v2 = vpop.f32.mrf.mxu0  ;;  %v1044_v44 = vpop.f32.mrf.mxu1 }
 0x1e3   : > { %v3587_v60 = vmul.f32 %v1044_v44, %v817_v2 }
 0x1e4   : > { %v821_v49 = vpop.f32.mrf.mxu0  ;;  %v1048_v53 = vpop.f32.mrf.mxu1  ;;  %2615 = vmatmul.mubr.msk.f32.gmra.mxu0 %vm330_vm0, %v3100_v5  ;;  %2633 = vmatmul.mubr.msk.f32.gmra.mxu1 %vm330_vm0, %v3105_v6 }
 0x1e5   : > { %v3593_v3 = vmul.f32 %v1048_v53, %v821_v49  ;;  %2061 = vmatprep.mubr.f32.mxu0 %v2752_v8  ;;  %2234 = vmatprep.mubr.f32.mxu1 %v2752_v8 }
 0x1e6   : > { %v823_v4 = vpop.f32.mrf.mxu0  ;;  %v1050_v20 = vpop.f32.mrf.mxu1 }
 0x1e7   : > { %v3597_v62 = vmul.f32 %v1050_v20, %v823_v4 }
 0x1e8   : > { %v827_v25 = vpop.f32.mrf.mxu0  ;;  %v1054_v27 = vpop.f32.mrf.mxu1  ;;  %2616 = vmatmul.mubr.msk.f32.gmra.mxu0 %vm330_vm0, %v3116_v7  ;;  %2634 = vmatmul.mubr.msk.f32.gmra.mxu1 %vm330_vm0, %v3121_v9 }
 0x1e9   : > { %v3603_v5 = vmul.f32 %v1054_v27, %v827_v25  ;;  %2067 = vmatprep.mubr.f32.mxu0 %v2752_v8  ;;  %2240 = vmatprep.mubr.f32.mxu1 %v2752_v8 }
 0x1ea   : > { %v829_v6 = vpop.f32.mrf.mxu0  ;;  %v1056_v28 = vpop.f32.mrf.mxu1 }
 0x1eb   : > { %v3607_v0 = vmul.f32 %v1056_v28, %v829_v6 }
 0x1ec   : > { %v1161_v31 = vpop.f32.mrf.mxu0  ;;  %v1334_v36 = vpop.f32.mrf.mxu1  ;;  %2617 = vmatmul.mubr.msk.f32.gmra.mxu0 %vm330_vm0, %v3132_v10  ;;  %2635 = vmatmul.mubr.msk.f32.gmra.mxu1 %vm330_vm0, %v3137_v11 }
 0x1ed   : > { %v1441_v7 = vmul.f32 %v1334_v36, %v1161_v31  ;;  %2073 = vmatprep.mubr.f32.mxu0 %v2752_v8  ;;  %2246 = vmatprep.mubr.f32.mxu1 %v2752_v8 }
 0x1ee   : > { %v1163_v9 = vpop.f32.mrf.mxu0  ;;  %v1336_v38 = vpop.f32.mrf.mxu1 }
 0x1ef   : > { %v3616_v2 = vadd.f32 %v1441_v7, %v3433_v32  ;;  %v1442_v44 = vmul.f32 %v1336_v38, %v1163_v9 }
 0x1f0   : > { %v1167_v49 = vpop.f32.mrf.mxu0  ;;  %v1340_v53 = vpop.f32.mrf.mxu1  ;;  %2618 = vmatmul.mubr.msk.f32.gmra.mxu0 %vm330_vm0, %v3148_v12  ;;  %2636 = vmatmul.mubr.msk.f32.gmra.mxu1 %vm330_vm0, %v3153_v13 }
 0x1f1   : > { %v3623_v10 = vadd.f32 %v1442_v44, %v3437_v37  ;;  %v1443_v11 = vmul.f32 %v1340_v53, %v1167_v49  ;;  %2079 = vmatprep.mubr.f32.mxu0 %v2752_v8  ;;  %2252 = vmatprep.mubr.f32.mxu1 %v2752_v8 }
 0x1f2   : > { %v1169_v4 = vpop.f32.mrf.mxu0  ;;  %v1342_v32 = vpop.f32.mrf.mxu1 }
 0x1f3   : > { %v3628_v20 = vadd.f32 %v1443_v11, %v3443_v42  ;;  %v1444_v25 = vmul.f32 %v1342_v32, %v1169_v4 }
 0x1f4   : > { %v1173_v27 = vpop.f32.mrf.mxu0  ;;  %v1346_v6 = vpop.f32.mrf.mxu1  ;;  %2619 = vmatmul.mubr.msk.f32.gmra.mxu0 %vm330_vm0, %v3164_v14  ;;  %2637 = vmatmul.mubr.msk.f32.gmra.mxu1 %vm330_vm0, %v3169_v15 }
 0x1f5   : > { %v3635_v12 = vadd.f32 %v1444_v25, %v3447_v47  ;;  %v1445_v13 = vmul.f32 %v1346_v6, %v1173_v27  ;;  %2085 = vmatprep.mubr.f32.mxu0 %v2752_v8  ;;  %2258 = vmatprep.mubr.f32.mxu1 %v2752_v8 }
 0x1f6   : > { %v1175_v37 = vpop.f32.mrf.mxu0  ;;  %v1348_v42 = vpop.f32.mrf.mxu1 }
 0x1f7   : > { %v3640_v28 = vadd.f32 %v1445_v13, %v3453_v50  ;;  %v1446_v31 = vmul.f32 %v1348_v42, %v1175_v37 }
 0x1f8   : > { %v1179_v36 = vpop.f32.mrf.mxu0  ;;  %v1352_v7 = vpop.f32.mrf.mxu1  ;;  %2620 = vmatmul.mubr.msk.f32.gmra.mxu0 %vm330_vm0, %v3180_v16  ;;  %2638 = vmatmul.mubr.msk.f32.gmra.mxu1 %vm330_vm0, %v3185_v17 }
 0x1f9   : > { %v3647_v14 = vadd.f32 %v1446_v31, %v3457_v55  ;;  %v1447_v15 = vmul.f32 %v1352_v7, %v1179_v36  ;;  %2091 = vmatprep.mubr.f32.mxu0 %v2752_v8  ;;  %2264 = vmatprep.mubr.f32.mxu1 %v2752_v8 }
 0x1fa   : > { %v1181_v47 = vpop.f32.mrf.mxu0  ;;  %v1354_v50 = vpop.f32.mrf.mxu1 }
 0x1fb   : > { %v3652_v9 = vadd.f32 %v1447_v15, %v3463_v21  ;;  %v1448_v38 = vmul.f32 %v1354_v50, %v1181_v47 }
 0x1fc   : > { %v1185_v44 = vpop.f32.mrf.mxu0  ;;  %v1358_v49 = vpop.f32.mrf.mxu1  ;;  %2621 = vmatmul.mubr.msk.f32.gmra.mxu0 %vm330_vm0, %v3196_v18  ;;  %2639 = vmatmul.mubr.msk.f32.gmra.mxu1 %vm330_vm0, %v3201_v19 }
 0x1fd   : > { %v3659_v16 = vadd.f32 %v1448_v38, %v3467_v26  ;;  %v1449_v17 = vmul.f32 %v1358_v49, %v1185_v44  ;;  %2097 = vmatprep.mubr.f32.mxu0 %v2752_v8  ;;  %2270 = vmatprep.mubr.f32.mxu1 %v2752_v8 }
 0x1fe   : > { %v1187_v55 = vpop.f32.mrf.mxu0  ;;  %v1360_v21 = vpop.f32.mrf.mxu1 }
 0x1ff   : > { %v3664_v53 = vadd.f32 %v1449_v17, %v3473_v29  ;;  %v1450_v11 = vmul.f32 %v1360_v21, %v1187_v55 }
 0x200   : > { %v1191_v4 = vpop.f32.mrf.mxu0  ;;  %v1364_v32 = vpop.f32.mrf.mxu1  ;;  %2622 = vmatmul.mubr.msk.f32.gmra.mxu0 %vm330_vm0, %v3216_v22  ;;  %2640 = vmatmul.mubr.msk.f32.gmra.mxu1 %vm330_vm0, %v3221_v23 }
 0x201   : > { %v3671_v18 = vadd.f32 %v1450_v11, %v3477_v35  ;;  %v1451_v19 = vmul.f32 %v1364_v32, %v1191_v4 }
 0x202   : > { %v1193_v26 = vpop.f32.mrf.mxu0  ;;  %v1366_v8 = vpop.f32.mrf.mxu1 }
 0x203   : > { %v3674_v25 = vadd.f32 %v1451_v19, %v3483_v41  ;;  %v1452_v29 = vmul.f32 %v1366_v8, %v1193_v26 }
 0x204   : > { %v1197_v27 = vpop.f32.mrf.mxu0  ;;  %v1370_v6 = vpop.f32.mrf.mxu1 }
 0x205   : > { %v3677_v13 = vadd.f32 %v1452_v29, %v3487_v48  ;;  %v1453_v37 = vmul.f32 %v1370_v6, %v1197_v27 }
 0x206   : > { %v1199_v22 = vpop.f32.mrf.mxu0  ;;  %v1372_v42 = vpop.f32.mrf.mxu1 }
 0x207   : > { %v3680_v23 = vadd.f32 %v1453_v37, %v3493_v54  ;;  %v1454_v35 = vmul.f32 %v1372_v42, %v1199_v22 }
 0x208   : > { %v1203_v31 = vpop.f32.mrf.mxu0  ;;  %v1376_v36 = vpop.f32.mrf.mxu1 }
 0x209   : > { %v3683_v7 = vadd.f32 %v1454_v35, %v3497_v24  ;;  %v1455_v41 = vmul.f32 %v1376_v36, %v1203_v31 }
 0x20a   : > { %v1205_v15 = vpop.f32.mrf.mxu0  ;;  %v1378_v47 = vpop.f32.mrf.mxu1 }
 0x20b   : > { %v3686_v50 = vadd.f32 %v1455_v41, %v3503_v33  ;;  %v1456_v48 = vmul.f32 %v1378_v47, %v1205_v15 }
 0x20c   : > { %v1209_v38 = vpop.f32.mrf.mxu0  ;;  %v1382_v44 = vpop.f32.mrf.mxu1 }
 0x20d   : > { %v3689_v49 = vadd.f32 %v1456_v48, %v3507_v30  ;;  %v1457_v54 = vmul.f32 %v1382_v44, %v1209_v38 }
 0x20e   : > { %v1211_v17 = vpop.f32.mrf.mxu0  ;;  %v1384_v55 = vpop.f32.mrf.mxu1 }
 0x20f   : > { %v3692_v21 = vadd.f32 %v1457_v54, %v3513_v39  ;;  %v1458_v24 = vmul.f32 %v1384_v55, %v1211_v17 }
 0x210   : > { %v1215_v11 = vpop.f32.mrf.mxu0  ;;  %v1388_v4 = vpop.f32.mrf.mxu1 }
 0x211   : > { %v3695_v32 = vadd.f32 %v1458_v24, %v3517_v43  ;;  %v1459_v33 = vmul.f32 %v1388_v4, %v1215_v11 }
 0x212   : > { %v1217_v19 = vpop.f32.mrf.mxu0  ;;  %v1390_v26 = vpop.f32.mrf.mxu1 }
 0x213   : > { %v3698_v8 = vadd.f32 %v1459_v33, %v3523_v45  ;;  %v1460_v30 = vmul.f32 %v1390_v26, %v1217_v19 }
 0x214   : > { %v1221_v29 = vpop.f32.mrf.mxu0  ;;  %v1394_v27 = vpop.f32.mrf.mxu1 }
 0x215   : > { %v3701_v6 = vadd.f32 %v1460_v30, %v3527_v56  ;;  %v1461_v39 = vmul.f32 %v1394_v27, %v1221_v29 }
 0x216   : > { %v1223_v37 = vpop.f32.mrf.mxu0  ;;  %v1396_v22 = vpop.f32.mrf.mxu1 }
 0x217   : > { %v3704_v42 = vadd.f32 %v1461_v39, %v3533_v51  ;;  %v1462_v43 = vmul.f32 %v1396_v22, %v1223_v37 }
 0x218   : > { %v1227_v35 = vpop.f32.mrf.mxu0  ;;  %v1400_v31 = vpop.f32.mrf.mxu1 }
 0x219   : > { %v3707_v36 = vadd.f32 %v1462_v43, %v3537_v34  ;;  %v1463_v45 = vmul.f32 %v1400_v31, %v1227_v35 }
 0x21a   : > { %v1229_v41 = vpop.f32.mrf.mxu0  ;;  %v1402_v15 = vpop.f32.mrf.mxu1 }
 0x21b   : > { %v3710_v47 = vadd.f32 %v1463_v45, %v3543_v57  ;;  %v1464_v56 = vmul.f32 %v1402_v15, %v1229_v41 }
 0x21c   : > { %v1233_v48 = vpop.f32.mrf.mxu0  ;;  %v1406_v38 = vpop.f32.mrf.mxu1 }
 0x21d   : > { %v3713_v44 = vadd.f32 %v1464_v56, %v3547_v40  ;;  %v1465_v51 = vmul.f32 %v1406_v38, %v1233_v48 }
 0x21e   : > { %v1235_v54 = vpop.f32.mrf.mxu0  ;;  %v1408_v17 = vpop.f32.mrf.mxu1 }
 0x21f   : > { %v3716_v55 = vadd.f32 %v1465_v51, %v3553_v59  ;;  %v1466_v34 = vmul.f32 %v1408_v17, %v1235_v54 }
 0x220   : > { %v1239_v24 = vpop.f32.mrf.mxu0  ;;  %v1412_v11 = vpop.f32.mrf.mxu1 }
 0x221   : > { %v3719_v4 = vadd.f32 %v1466_v34, %v3557_v46  ;;  %v1467_v57 = vmul.f32 %v1412_v11, %v1239_v24 }
 0x222   : > { %v1241_v33 = vpop.f32.mrf.mxu0  ;;  %v1414_v19 = vpop.f32.mrf.mxu1 }
 0x223   : > { %v3722_v26 = vadd.f32 %v1467_v57, %v3563_v61  ;;  %v1468_v40 = vmul.f32 %v1414_v19, %v1241_v33 }
 0x224   : > { %v1245_v30 = vpop.f32.mrf.mxu0  ;;  %v1418_v29 = vpop.f32.mrf.mxu1 }
 0x225   : > { %v3725_v27 = vadd.f32 %v1468_v40, %v3567_v52  ;;  %v1469_v59 = vmul.f32 %v1418_v29, %v1245_v30 }
 0x226   : > { %v1247_v39 = vpop.f32.mrf.mxu0  ;;  %v1420_v37 = vpop.f32.mrf.mxu1 }
 0x227   : > { %v3728_v22 = vadd.f32 %v1469_v59, %v3573_v63  ;;  %v1470_v46 = vmul.f32 %v1420_v37, %v1247_v39 }
 0x228   : > { %v1251_v43 = vpop.f32.mrf.mxu0  ;;  %v1424_v35 = vpop.f32.mrf.mxu1 }
 0x229   : > { %v3731_v31 = vadd.f32 %v1470_v46, %v3577_v58  ;;  %v1471_v61 = vmul.f32 %v1424_v35, %v1251_v43 }
 0x22a   : > { %v1253_v45 = vpop.f32.mrf.mxu0  ;;  %v1426_v41 = vpop.f32.mrf.mxu1 }
 0x22b   : > { %v3734_v15 = vadd.f32 %v1471_v61, %v3583_v1  ;;  %v1472_v52 = vmul.f32 %v1426_v41, %v1253_v45 }
 0x22c   : > { %v1257_v56 = vpop.f32.mrf.mxu0  ;;  %v1430_v48 = vpop.f32.mrf.mxu1 }
 0x22d   : > { %v3737_v38 = vadd.f32 %v1472_v52, %v3587_v60  ;;  %v1473_v63 = vmul.f32 %v1430_v48, %v1257_v56 }
 0x22e   : > { %v1259_v51 = vpop.f32.mrf.mxu0  ;;  %v1432_v54 = vpop.f32.mrf.mxu1 }
 0x22f   : > { %v3740_v17 = vadd.f32 %v1473_v63, %v3593_v3  ;;  %v1474_v58 = vmul.f32 %v1432_v54, %v1259_v51 }
 0x230   : > { %v1263_v34 = vpop.f32.mrf.mxu0  ;;  %v1436_v24 = vpop.f32.mrf.mxu1 }
 0x231   : > { %v3743_v11 = vadd.f32 %v1474_v58, %v3597_v62  ;;  %v1475_v1 = vmul.f32 %v1436_v24, %v1263_v34 }
 0x232   : > { %v1265_v57 = vpop.f32.mrf.mxu0  ;;  %v1438_v33 = vpop.f32.mrf.mxu1 }
 0x233   : > { %v3746_v19 = vadd.f32 %v1475_v1, %v3603_v5  ;;  %v1476_v60 = vmul.f32 %v1438_v33, %v1265_v57 }
 0x234   : > { %v1579_v40 = vpop.f32.mrf.mxu0  ;;  %v1752_v30 = vpop.f32.mrf.mxu1 }
 0x235   : > { %v3749_v29 = vadd.f32 %v1476_v60, %v3607_v0  ;;  %v1859_v3 = vmul.f32 %v1752_v30, %v1579_v40 }
 0x236   : > { %v1581_v59 = vpop.f32.mrf.mxu0  ;;  %v1754_v39 = vpop.f32.mrf.mxu1 }
 0x237   : > { %v3752_v37 = vadd.f32 %v1859_v3, %v3616_v2  ;;  %v1860_v62 = vmul.f32 %v1754_v39, %v1581_v59 }
 0x238   : > { %v1585_v46 = vpop.f32.mrf.mxu0  ;;  %v1758_v43 = vpop.f32.mrf.mxu1 }
 0x239   : > { %v3755_v35 = vadd.f32 %v1860_v62, %v3623_v10  ;;  %v1861_v5 = vmul.f32 %v1758_v43, %v1585_v46 }
 0x23a   : > { %v1587_v61 = vpop.f32.mrf.mxu0  ;;  %v1760_v45 = vpop.f32.mrf.mxu1 }
 0x23b   : > { %v3758_v41 = vadd.f32 %v1861_v5, %v3628_v20  ;;  %v1862_v0 = vmul.f32 %v1760_v45, %v1587_v61 }
 0x23c   : > { %v1591_v52 = vpop.f32.mrf.mxu0  ;;  %v1764_v56 = vpop.f32.mrf.mxu1 }
 0x23d   : > { %v3761_v48 = vadd.f32 %v1862_v0, %v3635_v12  ;;  %v1863_v2 = vmul.f32 %v1764_v56, %v1591_v52 }
 0x23e   : > { %v1593_v63 = vpop.f32.mrf.mxu0  ;;  %v1766_v51 = vpop.f32.mrf.mxu1 }
 0x23f   : > { %v3764_v54 = vadd.f32 %v1863_v2, %v3640_v28  ;;  %v1864_v10 = vmul.f32 %v1766_v51, %v1593_v63 }
 0x240   : > { %v1597_v58 = vpop.f32.mrf.mxu0  ;;  %v1770_v34 = vpop.f32.mrf.mxu1 }
 0x241   : > { %v3767_v24 = vadd.f32 %v1864_v10, %v3647_v14  ;;  %v1865_v20 = vmul.f32 %v1770_v34, %v1597_v58 }
 0x242   : > { %v1599_v1 = vpop.f32.mrf.mxu0  ;;  %v1772_v57 = vpop.f32.mrf.mxu1 }
 0x243   : > { %v3770_v33 = vadd.f32 %v1865_v20, %v3652_v9  ;;  %v1866_v12 = vmul.f32 %v1772_v57, %v1599_v1 }
 0x244   : > { %v1603_v60 = vpop.f32.mrf.mxu0  ;;  %v1776_v40 = vpop.f32.mrf.mxu1 }
 0x245   : > { %v3773_v30 = vadd.f32 %v1866_v12, %v3659_v16  ;;  %v1867_v28 = vmul.f32 %v1776_v40, %v1603_v60 }
 0x246   : > { %v1605_v3 = vpop.f32.mrf.mxu0  ;;  %v1778_v59 = vpop.f32.mrf.mxu1 }
 0x247   : > { %v3776_v39 = vadd.f32 %v1867_v28, %v3664_v53  ;;  %v1868_v14 = vmul.f32 %v1778_v59, %v1605_v3 }
 0x248   : > { %v1609_v62 = vpop.f32.mrf.mxu0  ;;  %v1782_v46 = vpop.f32.mrf.mxu1 }
 0x249   : > { %v3779_v43 = vadd.f32 %v1868_v14, %v3671_v18  ;;  %v1869_v9 = vmul.f32 %v1782_v46, %v1609_v62 }
 0x24a   : > { %v1611_v5 = vpop.f32.mrf.mxu0  ;;  %v1784_v61 = vpop.f32.mrf.mxu1 }
 0x24b   : > { %v3782_v45 = vadd.f32 %v1869_v9, %v3674_v25  ;;  %v1870_v16 = vmul.f32 %v1784_v61, %v1611_v5 }
 0x24c   : > { %v1615_v0 = vpop.f32.mrf.mxu0  ;;  %v1788_v52 = vpop.f32.mrf.mxu1 }
 0x24d   : > { %v3785_v56 = vadd.f32 %v1870_v16, %v3677_v13  ;;  %v1871_v53 = vmul.f32 %v1788_v52, %v1615_v0 }
 0x24e   : > { %v1617_v2 = vpop.f32.mrf.mxu0  ;;  %v1790_v63 = vpop.f32.mrf.mxu1 }
 0x24f   : > { %v3788_v51 = vadd.f32 %v1871_v53, %v3680_v23  ;;  %v1872_v18 = vmul.f32 %v1790_v63, %v1617_v2 }
 0x250   : > { %v1621_v10 = vpop.f32.mrf.mxu0  ;;  %v1794_v58 = vpop.f32.mrf.mxu1 }
 0x251   : > { %v3791_v34 = vadd.f32 %v1872_v18, %v3683_v7  ;;  %v1873_v25 = vmul.f32 %v1794_v58, %v1621_v10 }
 0x252   : > { %v1623_v20 = vpop.f32.mrf.mxu0  ;;  %v1796_v1 = vpop.f32.mrf.mxu1 }
 0x253   : > { %v3794_v57 = vadd.f32 %v1873_v25, %v3686_v50  ;;  %v1874_v13 = vmul.f32 %v1796_v1, %v1623_v20 }
 0x254   : > { %v1627_v12 = vpop.f32.mrf.mxu0  ;;  %v1800_v60 = vpop.f32.mrf.mxu1 }
 0x255   : > { %v3797_v40 = vadd.f32 %v1874_v13, %v3689_v49  ;;  %v1875_v23 = vmul.f32 %v1800_v60, %v1627_v12 }
 0x256   : > { %v1629_v28 = vpop.f32.mrf.mxu0  ;;  %v1802_v3 = vpop.f32.mrf.mxu1 }
 0x257   : > { %v3800_v59 = vadd.f32 %v1875_v23, %v3692_v21  ;;  %v1876_v7 = vmul.f32 %v1802_v3, %v1629_v28 }
 0x258   : > { %v1633_v14 = vpop.f32.mrf.mxu0  ;;  %v1806_v62 = vpop.f32.mrf.mxu1 }
 0x259   : > { %v3803_v46 = vadd.f32 %v1876_v7, %v3695_v32  ;;  %v1877_v50 = vmul.f32 %v1806_v62, %v1633_v14 }
 0x25a   : > { %v1635_v9 = vpop.f32.mrf.mxu0  ;;  %v1808_v5 = vpop.f32.mrf.mxu1 }
 0x25b   : > { %v3806_v61 = vadd.f32 %v1877_v50, %v3698_v8  ;;  %v1878_v49 = vmul.f32 %v1808_v5, %v1635_v9 }
 0x25c   : > { %v1639_v16 = vpop.f32.mrf.mxu0  ;;  %v1812_v0 = vpop.f32.mrf.mxu1 }
 0x25d   : > { %v3809_v52 = vadd.f32 %v1878_v49, %v3701_v6  ;;  %v1879_v21 = vmul.f32 %v1812_v0, %v1639_v16 }
 0x25e   : > { %v1641_v53 = vpop.f32.mrf.mxu0  ;;  %v1814_v2 = vpop.f32.mrf.mxu1 }
 0x25f   : > { %v3812_v63 = vadd.f32 %v1879_v21, %v3704_v42  ;;  %v1880_v32 = vmul.f32 %v1814_v2, %v1641_v53 }
 0x260   : > { %v1645_v18 = vpop.f32.mrf.mxu0  ;;  %v1818_v10 = vpop.f32.mrf.mxu1 }
 0x261   : > { %v3815_v58 = vadd.f32 %v1880_v32, %v3707_v36  ;;  %v1881_v8 = vmul.f32 %v1818_v10, %v1645_v18 }
 0x262   : > { %v1647_v25 = vpop.f32.mrf.mxu0  ;;  %v1820_v20 = vpop.f32.mrf.mxu1 }
 0x263   : > { %v3818_v1 = vadd.f32 %v1881_v8, %v3710_v47  ;;  %v1882_v6 = vmul.f32 %v1820_v20, %v1647_v25 }
 0x264   : > { %v1651_v13 = vpop.f32.mrf.mxu0  ;;  %v1824_v12 = vpop.f32.mrf.mxu1 }
 0x265   : > { %v3821_v60 = vadd.f32 %v1882_v6, %v3713_v44  ;;  %v1883_v42 = vmul.f32 %v1824_v12, %v1651_v13 }
 0x266   : > { %v1653_v23 = vpop.f32.mrf.mxu0  ;;  %v1826_v28 = vpop.f32.mrf.mxu1 }
 0x267   : > { %v3824_v3 = vadd.f32 %v1883_v42, %v3716_v55  ;;  %v1884_v36 = vmul.f32 %v1826_v28, %v1653_v23 }
 0x268   : > { %v1657_v7 = vpop.f32.mrf.mxu0  ;;  %v1830_v14 = vpop.f32.mrf.mxu1 }
 0x269   : > { %v3827_v62 = vadd.f32 %v1884_v36, %v3719_v4  ;;  %v1885_v47 = vmul.f32 %v1830_v14, %v1657_v7 }
 0x26a   : > { %v1659_v50 = vpop.f32.mrf.mxu0  ;;  %v1832_v9 = vpop.f32.mrf.mxu1 }
 0x26b   : > { %v3830_v5 = vadd.f32 %v1885_v47, %v3722_v26  ;;  %v1886_v44 = vmul.f32 %v1832_v9, %v1659_v50 }
 0x26c   : > { %v1663_v49 = vpop.f32.mrf.mxu0  ;;  %v1836_v16 = vpop.f32.mrf.mxu1 }
 0x26d   : > { %v3833_v0 = vadd.f32 %v1886_v44, %v3725_v27  ;;  %v1887_v55 = vmul.f32 %v1836_v16, %v1663_v49 }
 0x26e   : > { %v1665_v21 = vpop.f32.mrf.mxu0  ;;  %v1838_v53 = vpop.f32.mrf.mxu1 }
 0x26f   : > { %v3836_v2 = vadd.f32 %v1887_v55, %v3728_v22  ;;  %v1888_v4 = vmul.f32 %v1838_v53, %v1665_v21 }
 0x270   : > { %v1669_v32 = vpop.f32.mrf.mxu0  ;;  %v1842_v18 = vpop.f32.mrf.mxu1 }
 0x271   : > { %v3839_v10 = vadd.f32 %v1888_v4, %v3731_v31  ;;  %v1889_v26 = vmul.f32 %v1842_v18, %v1669_v32 }
 0x272   : > { %v1671_v8 = vpop.f32.mrf.mxu0  ;;  %v1844_v25 = vpop.f32.mrf.mxu1 }
 0x273   : > { %v3842_v20 = vadd.f32 %v1889_v26, %v3734_v15  ;;  %v1890_v27 = vmul.f32 %v1844_v25, %v1671_v8 }
 0x274   : > { %v1675_v6 = vpop.f32.mrf.mxu0  ;;  %v1848_v13 = vpop.f32.mrf.mxu1 }
 0x275   : > { %v3845_v22 = vadd.f32 %v1890_v27, %v3737_v38  ;;  %v1891_v12 = vmul.f32 %v1848_v13, %v1675_v6 }
 0x276   : > { %v1677_v42 = vpop.f32.mrf.mxu0  ;;  %v1850_v23 = vpop.f32.mrf.mxu1 }
 0x277   : > { %v3848_v28 = vadd.f32 %v1891_v12, %v3740_v17  ;;  %v1892_v31 = vmul.f32 %v1850_v23, %v1677_v42 }
 0x278   : > { %v1681_v36 = vpop.f32.mrf.mxu0  ;;  %v1854_v7 = vpop.f32.mrf.mxu1 }
 0x279   : > { %v3852_v15 = vadd.f32 %v1892_v31, %v3743_v11  ;;  %v1893_v14 = vmul.f32 %v1854_v7, %v1681_v36 }
 0x27a   : > { %v1683_v47 = vpop.f32.mrf.mxu0  ;;  %v1856_v50 = vpop.f32.mrf.mxu1 }
 0x27b   : > { %v3857_v38 = vadd.f32 %v1893_v14, %v3746_v19  ;;  %v1894_v9 = vmul.f32 %v1856_v50, %v1683_v47 }
 0x27c   : > { %v1997_v44 = vpop.f32.mrf.mxu0  ;;  %v2170_v49 = vpop.f32.mrf.mxu1 }
 0x27d   : > { %v3860_v17 = vadd.f32 %v1894_v9, %v3749_v29  ;;  %v2277_v16 = vmul.f32 %v2170_v49, %v1997_v44 }
 0x27e   : > { %v1999_v55 = vpop.f32.mrf.mxu0  ;;  %v2172_v21 = vpop.f32.mrf.mxu1 }
 0x27f   : > { %v2313_v11 = vadd.f32 %v2277_v16, %v3752_v37  ;;  %v2278_v53 = vmul.f32 %v2172_v21, %v1999_v55 }
 0x280   : > { %v2003_v4 = vpop.f32.mrf.mxu0  ;;  %v2176_v32 = vpop.f32.mrf.mxu1 }
 0x281   : > { %2349 = vst [vmem:[%s3863_s17] sm:$0xff] %v2313_v11  ;;  %v2314_v19 = vadd.f32 %v2278_v53, %v3755_v35  ;;  %v2279_v18 = vmul.f32 %v2176_v32, %v2003_v4 }
 0x282   : > { %v2005_v29 = vpop.f32.mrf.mxu0  ;;  %v2178_v26 = vpop.f32.mrf.mxu1 }
 0x283   : > { %2350 = vst.msk [vmem:[%s3863_s17 + $0x8] sm:$0xff] %vm330_vm0, %v2314_v19  ;;  %v2315_v37 = vadd.f32 %v2279_v18, %v3758_v41  ;;  %v2280_v8 = vmul.f32 %v2178_v26, %v2005_v29 }
 0x284   : > { %v2009_v25 = vpop.f32.mrf.mxu0  ;;  %v2182_v27 = vpop.f32.mrf.mxu1 }
 0x285   : > { %2351 = vst [vmem:[%s3863_s17 + $0x10] sm:$0xff] %v2315_v37  ;;  %v2316_v6 = vadd.f32 %v2280_v8, %v3761_v48  ;;  %v2281_v13 = vmul.f32 %v2182_v27, %v2009_v25 }
 0x286   : > { %v2011_v12 = vpop.f32.mrf.mxu0  ;;  %v2184_v42 = vpop.f32.mrf.mxu1 }
 0x287   : > { %2352 = vst.msk [vmem:[%s3863_s17 + $0x18] sm:$0xff] %vm330_vm0, %v2316_v6  ;;  %v2317_v35 = vadd.f32 %v2281_v13, %v3764_v54  ;;  %v2282_v23 = vmul.f32 %v2184_v42, %v2011_v12 }
 0x288   : > { %v2015_v31 = vpop.f32.mrf.mxu0  ;;  %v2188_v36 = vpop.f32.mrf.mxu1 }
 0x289   : > { %2353 = vst [vmem:[%s3863_s17 + $0x20] sm:$0xff] %v2317_v35  ;;  %v2318_v41 = vadd.f32 %v2282_v23, %v3767_v24  ;;  %v2283_v7 = vmul.f32 %v2188_v36, %v2015_v31 }
 0x28a   : > { %v2017_v14 = vpop.f32.mrf.mxu0  ;;  %v2190_v47 = vpop.f32.mrf.mxu1 }
 0x28b   : > { %2354 = vst.msk [vmem:[%s3863_s17 + $0x28] sm:$0xff] %vm330_vm0, %v2318_v41  ;;  %v2319_v48 = vadd.f32 %v2283_v7, %v3770_v33  ;;  %v2284_v50 = vmul.f32 %v2190_v47, %v2017_v14 }
 0x28c   : > { %v2021_v9 = vpop.f32.mrf.mxu0  ;;  %v2194_v44 = vpop.f32.mrf.mxu1 }
 0x28d   : > { %2355 = vst [vmem:[%s3863_s17 + $0x30] sm:$0xff] %v2319_v48  ;;  %v2320_v54 = vadd.f32 %v2284_v50, %v3773_v30  ;;  %v2285_v49 = vmul.f32 %v2194_v44, %v2021_v9 }
 0x28e   : > { %v2023_v16 = vpop.f32.mrf.mxu0  ;;  %v2196_v55 = vpop.f32.mrf.mxu1 }
 0x28f   : > { %2356 = vst.msk [vmem:[%s3863_s17 + $0x38] sm:$0xff] %vm330_vm0, %v2320_v54  ;;  %v2321_v24 = vadd.f32 %v2285_v49, %v3776_v39  ;;  %v2286_v21 = vmul.f32 %v2196_v55, %v2023_v16 }
 0x290   : > { %v2027_v11 = vpop.f32.mrf.mxu0  ;;  %v2200_v53 = vpop.f32.mrf.mxu1 }
 0x291   : > { %2357 = vst [vmem:[%s3863_s17 + $0x40] sm:$0xff] %v2321_v24  ;;  %v2322_v33 = vadd.f32 %v2286_v21, %v3779_v43  ;;  %v2287_v4 = vmul.f32 %v2200_v53, %v2027_v11 }
 0x292   : > { %v2029_v32 = vpop.f32.mrf.mxu0  ;;  %v2202_v19 = vpop.f32.mrf.mxu1 }
 0x293   : > { %2358 = vst.msk [vmem:[%s3863_s17 + $0x48] sm:$0xff] %vm330_vm0, %v2322_v33  ;;  %v2323_v30 = vadd.f32 %v2287_v4, %v3782_v45  ;;  %v2288_v18 = vmul.f32 %v2202_v19, %v2029_v32 }
 0x294   : > { %v2033_v29 = vpop.f32.mrf.mxu0  ;;  %v2206_v26 = vpop.f32.mrf.mxu1 }
 0x295   : > { %2359 = vst [vmem:[%s3863_s17 + $0x50] sm:$0xff] %v2323_v30  ;;  %v2324_v39 = vadd.f32 %v2288_v18, %v3785_v56  ;;  %v2289_v37 = vmul.f32 %v2206_v26, %v2033_v29 }
 0x296   : > { %v2035_v8 = vpop.f32.mrf.mxu0  ;;  %v2208_v25 = vpop.f32.mrf.mxu1 }
 0x297   : > { %2360 = vst.msk [vmem:[%s3863_s17 + $0x58] sm:$0xff] %vm330_vm0, %v2324_v39  ;;  %v2325_v43 = vadd.f32 %v2289_v37, %v3788_v51  ;;  %v2290_v27 = vmul.f32 %v2208_v25, %v2035_v8 }
 0x298   : > { %v2039_v6 = vpop.f32.mrf.mxu0  ;;  %v2212_v13 = vpop.f32.mrf.mxu1 }
 0x299   : > { %2361 = vst [vmem:[%s3863_s17 + $0x60] sm:$0xff] %v2325_v43  ;;  %v2326_v45 = vadd.f32 %v2290_v27, %v3791_v34  ;;  %v2291_v12 = vmul.f32 %v2212_v13, %v2039_v6 }
 0x29a   : > { %v2041_v42 = vpop.f32.mrf.mxu0  ;;  %v2214_v35 = vpop.f32.mrf.mxu1 }
 0x29b   : > { %2362 = vst.msk [vmem:[%s3863_s17 + $0x68] sm:$0xff] %vm330_vm0, %v2326_v45  ;;  %v2327_v56 = vadd.f32 %v2291_v12, %v3794_v57  ;;  %v2292_v23 = vmul.f32 %v2214_v35, %v2041_v42 }
 0x29c   : > { %v2045_v31 = vpop.f32.mrf.mxu0  ;;  %v2218_v36 = vpop.f32.mrf.mxu1 }
 0x29d   : > { %2363 = vst [vmem:[%s3863_s17 + $0x70] sm:$0xff] %v2327_v56  ;;  %v2328_v51 = vadd.f32 %v2292_v23, %v3797_v40  ;;  %v2293_v41 = vmul.f32 %v2218_v36, %v2045_v31 }
 0x29e   : > { %v2047_v7 = vpop.f32.mrf.mxu0  ;;  %v2220_v14 = vpop.f32.mrf.mxu1 }
 0x29f   : > { %2364 = vst.msk [vmem:[%s3863_s17 + $0x78] sm:$0xff] %vm330_vm0, %v2328_v51  ;;  %v2329_v34 = vadd.f32 %v2293_v41, %v3800_v59  ;;  %v2294_v47 = vmul.f32 %v2220_v14, %v2047_v7 }
 0x2a0   : > { %v2051_v48 = vpop.f32.mrf.mxu0  ;;  %v2224_v50 = vpop.f32.mrf.mxu1 }
 0x2a1   : > { %2365 = vst [vmem:[%s3863_s17 + $0x80] sm:$0xff] %v2329_v34  ;;  %v2330_v57 = vadd.f32 %v2294_v47, %v3803_v46  ;;  %v2295_v9 = vmul.f32 %v2224_v50, %v2051_v48 }
 0x2a2   : > { %v2053_v44 = vpop.f32.mrf.mxu0  ;;  %v2226_v54 = vpop.f32.mrf.mxu1 }
 0x2a3   : > { %2366 = vst.msk [vmem:[%s3863_s17 + $0x88] sm:$0xff] %vm330_vm0, %v2330_v57  ;;  %v2331_v40 = vadd.f32 %v2295_v9, %v3806_v61  ;;  %v2296_v49 = vmul.f32 %v2226_v54, %v2053_v44 }
 0x2a4   : > { %v2057_v16 = vpop.f32.mrf.mxu0  ;;  %v2230_v55 = vpop.f32.mrf.mxu1 }
 0x2a5   : > { %2367 = vst [vmem:[%s3863_s17 + $0x90] sm:$0xff] %v2331_v40  ;;  %v2332_v59 = vadd.f32 %v2296_v49, %v3809_v52  ;;  %v2297_v24 = vmul.f32 %v2230_v55, %v2057_v16 }
 0x2a6   : > { %v2059_v21 = vpop.f32.mrf.mxu0  ;;  %v2232_v11 = vpop.f32.mrf.mxu1 }
 0x2a7   : > { %2368 = vst.msk [vmem:[%s3863_s17 + $0x98] sm:$0xff] %vm330_vm0, %v2332_v59  ;;  %v2333_v46 = vadd.f32 %v2297_v24, %v3812_v63  ;;  %v2298_v53 = vmul.f32 %v2232_v11, %v2059_v21 }
 0x2a8   : > { %v2063_v33 = vpop.f32.mrf.mxu0  ;;  %v2236_v4 = vpop.f32.mrf.mxu1 }
 0x2a9   : > { %2369 = vst [vmem:[%s3863_s17 + $0xa0] sm:$0xff] %v2333_v46  ;;  %v2334_v61 = vadd.f32 %v2298_v53, %v3815_v58  ;;  %v2299_v32 = vmul.f32 %v2236_v4, %v2063_v33 }
 0x2aa   : > { %v2065_v19 = vpop.f32.mrf.mxu0  ;;  %v2238_v30 = vpop.f32.mrf.mxu1 }
 0x2ab   : > { %2370 = vst.msk [vmem:[%s3863_s17 + $0xa8] sm:$0xff] %vm330_vm0, %v2334_v61  ;;  %v2335_v52 = vadd.f32 %v2299_v32, %v3818_v1  ;;  %v2300_v18 = vmul.f32 %v2238_v30, %v2065_v19 }
 0x2ac   : > { %v2069_v29 = vpop.f32.mrf.mxu0  ;;  %v2242_v26 = vpop.f32.mrf.mxu1 }
 0x2ad   : > { %2371 = vst [vmem:[%s3863_s17 + $0xb0] sm:$0xff] %v2335_v52  ;;  %v2336_v63 = vadd.f32 %v2300_v18, %v3821_v60  ;;  %v2301_v39 = vmul.f32 %v2242_v26, %v2069_v29 }
 0x2ae   : > { %v2071_v37 = vpop.f32.mrf.mxu0  ;;  %v2244_v8 = vpop.f32.mrf.mxu1 }
 0x2af   : > { %2372 = vst.msk [vmem:[%s3863_s17 + $0xb8] sm:$0xff] %vm330_vm0, %v2336_v63  ;;  %v2337_v58 = vadd.f32 %v2301_v39, %v3824_v3  ;;  %v2302_v25 = vmul.f32 %v2244_v8, %v2071_v37 }
 0x2b0   : > { %v2075_v43 = vpop.f32.mrf.mxu0  ;;  %v2248_v27 = vpop.f32.mrf.mxu1 }
 0x2b1   : > { %2373 = vst [vmem:[%s3863_s17 + $0xc0] sm:$0xff] %v2337_v58  ;;  %v2338_v1 = vadd.f32 %v2302_v25, %v3827_v62  ;;  %v2303_v6 = vmul.f32 %v2248_v27, %v2075_v43 }
 0x2b2   : > { %v2077_v13 = vpop.f32.mrf.mxu0  ;;  %v2250_v45 = vpop.f32.mrf.mxu1 }
 0x2b3   : > { %2374 = vst.msk [vmem:[%s3863_s17 + $0xc8] sm:$0xff] %vm330_vm0, %v2338_v1  ;;  %v2339_v60 = vadd.f32 %v2303_v6, %v3830_v5  ;;  %v2304_v12 = vmul.f32 %v2250_v45, %v2077_v13 }
 0x2b4   : > { %v2081_v42 = vpop.f32.mrf.mxu0  ;;  %v2254_v35 = vpop.f32.mrf.mxu1 }
 0x2b5   : > { %2375 = vst [vmem:[%s3863_s17 + $0xd0] sm:$0xff] %v2339_v60  ;;  %v2340_v3 = vadd.f32 %v2304_v12, %v3833_v0  ;;  %v2305_v56 = vmul.f32 %v2254_v35, %v2081_v42 }
 0x2b6   : > { %v2083_v23 = vpop.f32.mrf.mxu0  ;;  %v2256_v31 = vpop.f32.mrf.mxu1 }
 0x2b7   : > { %2376 = vst.msk [vmem:[%s3863_s17 + $0xd8] sm:$0xff] %vm330_vm0, %v2340_v3  ;;  %v2341_v62 = vadd.f32 %v2305_v56, %v3836_v2  ;;  %v2306_v36 = vmul.f32 %v2256_v31, %v2083_v23 }
 0x2b8   : > { %v2087_v51 = vpop.f32.mrf.mxu0  ;;  %v2260_v41 = vpop.f32.mrf.mxu1 }
 0x2b9   : > { %2377 = vst [vmem:[%s3863_s17 + $0xe0] sm:$0xff] %v2341_v62  ;;  %v2342_v5 = vadd.f32 %v2306_v36, %v3839_v10  ;;  %v2307_v7 = vmul.f32 %v2260_v41, %v2087_v51 }
 0x2ba   : > { %v2089_v14 = vpop.f32.mrf.mxu0  ;;  %v2262_v34 = vpop.f32.mrf.mxu1 }
 0x2bb   : > { %2378 = vst.msk [vmem:[%s3863_s17 + $0xe8] sm:$0xff] %vm330_vm0, %v2342_v5  ;;  %v2343_v0 = vadd.f32 %v2307_v7, %v3842_v20  ;;  %v2308_v47 = vmul.f32 %v2262_v34, %v2089_v14 }
 0x2bc   : > { %v2093_v48 = vpop.f32.mrf.mxu0  ;;  %v2266_v2 = vpop.f32.mrf.mxu1 }
 0x2bd   : > { %2379 = vst [vmem:[%s3863_s17 + $0xf0] sm:$0xff] %v2343_v0  ;;  %v2344_v50 = vadd.f32 %v2308_v47, %v3845_v22  ;;  %v2309_v57 = vmul.f32 %v2266_v2, %v2093_v48 }
 0x2be   : > { %v2095_v9 = vpop.f32.mrf.mxu0  ;;  %v2268_v10 = vpop.f32.mrf.mxu1 }
 0x2bf   : > { %2380 = vst.msk [vmem:[%s3863_s17 + $0xf8] sm:$0xff] %vm330_vm0, %v2344_v50  ;;  %v2345_v44 = vadd.f32 %v2309_v57, %v3848_v28  ;;  %v2310_v54 = vmul.f32 %v2268_v10, %v2095_v9 }
 0x2c0   : > { %v2099_v40 = vpop.f32.mrf.mxu0  ;;  %v2272_v20 = vpop.f32.mrf.mxu1 }
 0x2c1   : > { %2381 = vst [vmem:[%s3863_s17 + $0x100] sm:$0xff] %v2345_v44  ;;  %v2346_v49 = vadd.f32 %v2310_v54, %v3852_v15  ;;  %v2311_v22 = vmul.f32 %v2272_v20, %v2099_v40 }
 0x2c2   : > { %v2101_v16 = vpop.f32.mrf.mxu0  ;;  %v2274_v55 = vpop.f32.mrf.mxu1 }
 0x2c3   : > { %2382 = vst.msk [vmem:[%s3863_s17 + $0x108] sm:$0xff] %vm330_vm0, %v2346_v49  ;;  %v2347_v59 = vadd.f32 %v2311_v22, %v3857_v38  ;;  %v2312_v28 = vmul.f32 %v2274_v55, %v2101_v16 }
 0x2c5   : > { %2383 = vst [vmem:[%s3863_s17 + $0x110] sm:$0xff] %v2347_v59  ;;  %v2348_v15 = vadd.f32 %v2312_v28, %v3860_v17 }
 0x2c7   : > { %2384 = vst.msk [vmem:[%s3863_s17 + $0x118] sm:$0xff] %vm330_vm0, %v2348_v15 }
 0x2c8   : > { %2703 = shalt.err (!%p2700_p3)
}
 0x2c9   : > { %s2704_s12 = scalar_lea.hbm %s3955_s28, 4608  ;;  %s2708_s15 = scalar_lea.hbm %s4011_s6, 9216 }
 0x2ca   : > { %p2705_p4 = scmp.ne.s32.totalorder %s3955_s28, %s2704_s12  ;;  %p2709_p9 = scmp.lt.s32.totalorder %s3955_s28, %s4011_s6 }
 0x2cb   : > { %p2710_p10 = scmp.lt.s32.totalorder %s2708_s15, %s2704_s12 }
 0x2cc   : > { %p2706_p7 = pnand %p2705_p4, %p2829_p5 }
 0x2cd   : > { %p2711_p11 = por %p2710_p10, %p2709_p9 }
 0x2ce   : > { %p2707_p8 = pneg %p2706_p7 }
 0x2d0   : > { %p2712_p12 = pnand %p2711_p11, %p2707_p8 }
 0x2d2   : > { %2715 = shalt.err (!%p2712_p12)
}
 0x2d3   : > { %s2754_s18 = smov 256   ;;  %s2755_s20 = smov 16  }
 0x2d4   : > { %2648 = dma.vmem_to_hbm [thread:$0]  (%p2829_p5), %s3957_s19, 4608, %s3955_s28, %s3965_s25, %s2754_s18, %s2754_s18, %s2755_s20  }
 0x2d5 PF: > { %p2654_p13 = scmp.ge.s32.totalorder %s2750_s24, 2  ;;  %s2414_s26 = sand.u32 1, %s2738_s21  }
 0x2d6   : > { %s2415_s29 = scalar_lea.sflag [#allocation3], %s2414_s26 }
 0x2d7   : > { %p2651_p0 = pnand %p2654_p13, %p2833_p6 }
 0x2d9   : > { %p2652_p1 = pneg %p2651_p0 }
 0x2db   : > { %2733 = dma.done.wait (%p2652_p1), %s2415_s29, 4608  }
 0x2dc   : > { %2735 = vsyncadd (%p2652_p1), %s2415_s29, 4294962688  ;;  %p16_p2 = scmp.ge.s32.totalorder %s2816_s27, 4   ;;  %s4014_s21 = smov %s2742_s22 }
 0x2dd   : > { %s4015_s22 = smov %s2746_s23  ;;  %s4016_s23 = smov %s2827_s30 }
 0x2de   : > { %s4017_s24 = smov %s2816_s27  ;;  %18 = sbr.rel (!%p16_p2) target bundleno = 3 (0x3), region = 82 }
 0x2e3   :  { %2420 = vsyncpa [#allocation3], 1 }
 0x2e4   :  { %2422 = vsyncpa [#allocation3 + $0x1], 1 }

</bundles_post_ra>
